<compile_context>
chip_gen: v6e
topology: v6e:2x2x1
jax: 0.10.0
libtpu: 0.0.40
codegen_flags: <defaults>
</compile_context>

<pallas_src>
import math

import jax
import jax.numpy as jnp
from jax import lax
from jax.experimental import pallas as pl
from jax.experimental.pallas import tpu as pltpu

NUM_PARALLEL = 2
EPS = 1e-6
LANES = 128


def _sublane_rows(dtype) -> int:
    """Minimum row granularity for the dtype's sublane packing."""
    return max(8, 32 // jnp.dtype(dtype).itemsize)


def _vmem_config():
    """(vmem_limit_bytes, residency_budget_bytes), adapted to the generation."""
    phys = None
    try:
        info = pltpu.get_tpu_info()
        phys = getattr(info, "vmem_capacity_bytes", None)
    except Exception:
        phys = None
    if phys is None:
        phys = 64 * 1024 * 1024                      # conservative: v7x per-TC
    if phys >= 128 * 1024 * 1024:                    # v5e / v6e
        return 64 * 1024 * 1024, 40 * 1024 * 1024
    return 44 * 1024 * 1024, 26 * 1024 * 1024        # v7x (64 MiB per TC)


def _choose_tile_rows(rows, lane_width, itemsize, num_parallel, budget_bytes, sub):
    """Byte-driven row-tile: streamed blocks (double-buffered) + f32 temps."""
    stream_per_row = 2 * 2 * num_parallel * lane_width * itemsize   # P in + P out, dbl-buf
    temps_per_row = 3 * num_parallel * lane_width * 4               # x32 / xc / y in f32
    per_row = stream_per_row + temps_per_row
    t = max(sub, budget_bytes // per_row)
    # Keep >=4 (>=2 for small inputs) grid steps: shards across both v7x TCs
    # and keeps the DMA pipeline overlapped; negligible cost on v5e/v6e.
    if rows >= 4 * sub:
        t = min(t, rows // 4)
    elif rows >= 2 * sub:
        t = min(t, rows // 2)
    t = max(sub, (t // sub) * sub)
    if t >= rows:
        return rows
    return t


def _make_kernel(num_parallel, inv_c, eps, seg_matmul):
    """Fused P-branch LayerNorm kernel.

    seg_matmul=True  -> lane-dense mode: each (tile, 128) row packs 128/C
                        original rows; per-segment sums via block-diag matmul.
    seg_matmul=False -> standard mode: reduce over the (full-C) last axis.
    """
    P = num_parallel

    def kernel(*refs):
        x_refs = refs[:P]
        w_all = refs[P][...]          # (P, lane_width), f32
        b_all = refs[P + 1][...]      # (P, lane_width), f32
        off = P + 2
        if seg_matmul:
            seg_m = refs[off][...]    # (128, 128) block-diagonal ones, f32
            off += 1
        o_refs = refs[off:]

        for p in range(P):
            x = x_refs[p][...].astype(jnp.float32)          # (tile, lane_width)
            w = w_all[p:p + 1, :]                           # (1, lane_width)
            b = b_all[p:p + 1, :]                           # (1, lane_width)
            if seg_matmul:
                # Segmented sum + broadcast-back in one MXU matmul (exact in
                # f32 via HIGHEST precision); two-pass variance.
                mean = jnp.dot(x, seg_m,
                               precision=lax.Precision.HIGHEST,
                               preferred_element_type=jnp.float32) * inv_c
                xc = x - mean
                var = jnp.dot(xc * xc, seg_m,
                              precision=lax.Precision.HIGHEST,
                              preferred_element_type=jnp.float32) * inv_c
            else:
                mean = jnp.sum(x, axis=-1, keepdims=True) * inv_c
                xc = x - mean
                var = jnp.sum(xc * xc, axis=-1, keepdims=True) * inv_c
            inv = lax.rsqrt(var + eps)
            y = xc * (inv * w) + b
            o_refs[p][...] = y.astype(o_refs[p].dtype)

    return kernel


def layer_norm_parallel_pallas(xs, weights, biases, *, tile_rows=None):
    """Fused LayerNorm over the last axis for P same-shaped tensors.

    xs:      list of P arrays (..., C), identical shape/dtype.
    weights: list of P arrays (C,);  biases: list of P arrays (C,).
    Returns: list of P arrays, same shape/dtype as the inputs.
    """
    P = len(xs)
    assert P == len(weights) == len(biases) and P >= 1
    shape, dtype = xs[0].shape, xs[0].dtype
    for x in xs:
        assert x.shape == shape and x.dtype == dtype, "fused path needs equal shapes"

    C = shape[-1]
    rows = math.prod(shape[:-1]) if len(shape) > 1 else 1
    itemsize = jnp.dtype(dtype).itemsize
    sub = _sublane_rows(dtype)
    vmem_limit, budget = _vmem_config()

    # Lane-dense re-blocking is possible when 128 is a multiple of C and the
    # flat size is a multiple of 128 (always true for the mix_transformer
    # C=32/64 stages).  Otherwise fall back to the standard per-row layout.
    lane_dense = (C < LANES) and (LANES % C == 0) and ((rows * C) % LANES == 0)

    if lane_dense:
        seg = LANES // C
        k_rows = (rows * C) // LANES
        lane_width = LANES
        x_proc = [x.reshape(k_rows, LANES) for x in xs]                 # free view
        w_all = jnp.stack([jnp.tile(jnp.asarray(w, jnp.float32).reshape(C), seg)
                           for w in weights])
        b_all = jnp.stack([jnp.tile(jnp.asarray(b, jnp.float32).reshape(C), seg)
                           for b in biases])
        idx = jnp.arange(LANES, dtype=jnp.int32) // C
        seg_m = (idx[:, None] == idx[None, :]).astype(jnp.float32)      # (128,128)
    else:
        k_rows = rows
        lane_width = C
        x_proc = [x.reshape(rows, C) for x in xs]                       # free view
        w_all = jnp.stack([jnp.asarray(w, jnp.float32).reshape(C) for w in weights])
        b_all = jnp.stack([jnp.asarray(b, jnp.float32).reshape(C) for b in biases])
        seg_m = None

    if tile_rows is None:
        tile_rows = _choose_tile_rows(k_rows, lane_width, itemsize, P, budget, sub)
    else:
        tile_rows = int(tile_rows)
        if tile_rows < k_rows and tile_rows % sub != 0:
            raise ValueError(f"tile_rows must be a multiple of {sub} for {dtype}")
        tile_rows = max(1, min(tile_rows, k_rows))
    grid = (pl.cdiv(k_rows, tile_rows),)   # ragged tail: partial-block masking

    kernel = _make_kernel(P, 1.0 / float(C), EPS, lane_dense)

    x_spec = pl.BlockSpec((tile_rows, lane_width), lambda i: (i, 0))
    wb_spec = pl.BlockSpec((P, lane_width), lambda i: (0, 0))   # constant -> one DMA
    in_specs = [x_spec] * P + [wb_spec, wb_spec]
    operands = list(x_proc) + [w_all, b_all]
    if lane_dense:
        in_specs.append(pl.BlockSpec((LANES, LANES), lambda i: (0, 0)))
        operands.append(seg_m)

    out = pl.pallas_call(
        kernel,
        out_shape=tuple(jax.ShapeDtypeStruct((k_rows, lane_width), dtype)
                        for _ in range(P)),
        grid_spec=pltpu.PrefetchScalarGridSpec(
            num_scalar_prefetch=0,
            grid=grid,
            in_specs=in_specs,
            out_specs=tuple(pl.BlockSpec((tile_rows, lane_width), lambda i: (i, 0))
                            for _ in range(P)),
        ),
        compiler_params=pltpu.CompilerParams(
            dimension_semantics=("parallel",),      # shard row tiles across TCs
            vmem_limit_bytes=vmem_limit,
        ),
    )(*operands)

    if lane_dense:
        return [o.reshape(rows, C).reshape(shape) for o in out]
    return [o.reshape(shape) for o in out]


class LayerNormParallel:
    """JAX/Pallas port of mix_transformer_linfus.LayerNormParallel."""

    def __init__(self, num_features, key=None):
        self.num_features = num_features
        if key is None:
            key = jax.random.PRNGKey(0)
        self.weights, self.biases = [], []
        for _ in range(NUM_PARALLEL):
            # nn.LayerNorm default init is weight=1, bias=0; add a small
            # deterministic perturbation so each branch is distinct/exercised.
            kw, kb, key = jax.random.split(key, 3)
            w = jnp.ones((num_features,), jnp.float32) \
                + 0.01 * jax.random.normal(kw, (num_features,), jnp.float32)
            b = 0.01 * jax.random.normal(kb, (num_features,), jnp.float32)
            self.weights.append(w)
            self.biases.append(b)

    def __call__(self, x_parallel, *, tile_rows=None):
        assert len(x_parallel) == NUM_PARALLEL
        same = all(x.shape == x_parallel[0].shape and x.dtype == x_parallel[0].dtype
                   for x in x_parallel)
        if same:
            return layer_norm_parallel_pallas(list(x_parallel), self.weights,
                                              self.biases, tile_rows=tile_rows)
        # Fallback for mismatched shapes: per-branch calls (same kernel, P=1).
        return [layer_norm_parallel_pallas([x], [self.weights[i]], [self.biases[i]],
                                           tile_rows=tile_rows)[0]
                for i, x in enumerate(x_parallel)]


def _layer_norm_ref(x, w, b):
    """Pure-JAX reference with torch.nn.LayerNorm semantics (f32 result)."""
    x32 = x.astype(jnp.float32)
    mean = jnp.mean(x32, axis=-1, keepdims=True)
    var = jnp.mean((x32 - mean) ** 2, axis=-1, keepdims=True)
    return (x32 - mean) / jnp.sqrt(var + EPS) * w + b


def _check(xs, module, outs, tol):
    for x, w, b, o in zip(xs, module.weights, module.biases, outs):
        assert o.shape == x.shape and o.dtype == x.dtype
        ref = _layer_norm_ref(x, w, b)
        err = jnp.max(jnp.abs(o.astype(jnp.float32) - ref))
        assert err < tol, f"max err {err} >= {tol}"


if __name__ == "__main__":
    key = jax.random.PRNGKey(0)
    k0, k1, k2, k3, kp, kp2 = jax.random.split(key, 6)

    # 1) Lane-dense path (C=32 < 128), f32: batch=2, tokens=64, features=32.
    B, N, C = 2, 64, 32
    module = LayerNormParallel(num_features=C, key=kp)
    x0 = jax.random.normal(k0, (B, N, C), jnp.float32)
    x1 = jax.random.normal(k1, (B, N, C), jnp.float32)
    outs = [jax.block_until_ready(o) for o in module([x0, x1])]
    _check([x0, x1], module, outs, 5e-5)

    # 2) Same shapes in bf16 (sublane packing = 16, lane-dense path).
    xb0 = x0.astype(jnp.bfloat16)
    xb1 = x1.astype(jnp.bfloat16)
    outs_bf = [jax.block_until_ready(o) for o in module([xb0, xb1])]
    _check([xb0, xb1], module, outs_bf, 5e-2)

    # 3) Standard path (C=160 >= 128, not a divisor of 128), f32.
    B2, N2, C2 = 2, 8, 160
    module2 = LayerNormParallel(num_features=C2, key=kp2)
    y0 = jax.random.normal(k2, (B2, N2, C2), jnp.float32)
    y1 = jax.random.normal(k3, (B2, N2, C2), jnp.float32)
    outs2 = [jax.block_until_ready(o) for o in module2([y0, y1])]
    _check([y0, y1], module2, outs2, 5e-5)

    print("KERNEL_OK")
</pallas_src>

<mosaic_0001>
module attributes {stable_mosaic.version = 11 : i64} {
  func.func @kernel(%arg0: i32, %arg1: memref<8x128xf32, #tpu.memory_space<vmem>>, %arg2: memref<8x128xf32, #tpu.memory_space<vmem>>, %arg3: memref<2x128xf32, #tpu.memory_space<vmem>>, %arg4: memref<2x128xf32, #tpu.memory_space<vmem>>, %arg5: memref<128x128xf32, #tpu.memory_space<vmem>>, %arg6: memref<8x128xf32, #tpu.memory_space<vmem>>, %arg7: memref<8x128xf32, #tpu.memory_space<vmem>>) attributes {dimension_semantics = [#tpu.dimension_semantics<parallel>], iteration_bounds = array<i64: 4>, scalar_prefetch = 0 : i64, scratch_operands = 0 : i64, tpu.core_type = #tpu.core_type<tc>, window_params = [{transform_indices = @transform_0, window_bounds = array<i64: 8, 128>}, {transform_indices = @transform_1, window_bounds = array<i64: 8, 128>}, {pipeline_mode = #tpu.pipeline_mode<synchronous>, transform_indices = @transform_2, window_bounds = array<i64: 2, 128>}, {pipeline_mode = #tpu.pipeline_mode<synchronous>, transform_indices = @transform_3, window_bounds = array<i64: 2, 128>}, {pipeline_mode = #tpu.pipeline_mode<synchronous>, transform_indices = @transform_4, window_bounds = array<i64: 128, 128>}, {transform_indices = @transform_5, window_bounds = array<i64: 8, 128>}, {transform_indices = @transform_6, window_bounds = array<i64: 8, 128>}]} {
    %c0 = arith.constant 0 : index
    %c0_0 = arith.constant 0 : index
    %0 = vector.load %arg3[%c0, %c0_0] : memref<2x128xf32, #tpu.memory_space<vmem>>, vector<2x128xf32>
    %c0_1 = arith.constant 0 : index
    %c0_2 = arith.constant 0 : index
    %1 = vector.load %arg4[%c0_1, %c0_2] : memref<2x128xf32, #tpu.memory_space<vmem>>, vector<2x128xf32>
    %c0_3 = arith.constant 0 : index
    %c0_4 = arith.constant 0 : index
    %2 = vector.load %arg5[%c0_3, %c0_4] : memref<128x128xf32, #tpu.memory_space<vmem>>, vector<128x128xf32>
    %c0_5 = arith.constant 0 : index
    %c0_6 = arith.constant 0 : index
    %3 = vector.load %arg1[%c0_5, %c0_6] : memref<8x128xf32, #tpu.memory_space<vmem>>, vector<8x128xf32>
    %4 = vector.extract_strided_slice %0 {offsets = [0, 0], sizes = [1, 128], strides = [1, 1]} : vector<2x128xf32> to vector<1x128xf32>
    %5 = vector.extract_strided_slice %1 {offsets = [0, 0], sizes = [1, 128], strides = [1, 1]} : vector<2x128xf32> to vector<1x128xf32>
    %cst = arith.constant dense<0.000000e+00> : vector<8x128xf32>
    %6 = tpu.matmul %3, %2, %cst {dimension_numbers = #tpu.dot_dimension_numbers<[1], [0], [0], [1], [0, 0, 1, 1], [], []>, precision = #tpu.contract_precision<fp32>} : vector<8x128xf32>, vector<128x128xf32>, vector<8x128xf32> -> vector<8x128xf32>
    %cst_7 = arith.constant 3.125000e-02 : f32
    %7 = vector.broadcast %cst_7 : f32 to vector<8x128xf32>
    %8 = arith.mulf %6, %7 : vector<8x128xf32>
    %9 = arith.subf %3, %8 : vector<8x128xf32>
    %10 = arith.mulf %9, %9 : vector<8x128xf32>
    %cst_8 = arith.constant dense<0.000000e+00> : vector<8x128xf32>
    %11 = tpu.matmul %10, %2, %cst_8 {dimension_numbers = #tpu.dot_dimension_numbers<[1], [0], [0], [1], [0, 0, 1, 1], [], []>, precision = #tpu.contract_precision<fp32>} : vector<8x128xf32>, vector<128x128xf32>, vector<8x128xf32> -> vector<8x128xf32>
    %cst_9 = arith.constant 3.125000e-02 : f32
    %12 = vector.broadcast %cst_9 : f32 to vector<8x128xf32>
    %13 = arith.mulf %11, %12 : vector<8x128xf32>
    %cst_10 = arith.constant 9.99999997E-7 : f32
    %14 = vector.broadcast %cst_10 : f32 to vector<8x128xf32>
    %15 = arith.addf %13, %14 : vector<8x128xf32>
    %16 = math.rsqrt %15 : vector<8x128xf32>
    %17 = vector.broadcast %4 : vector<1x128xf32> to vector<8x128xf32>
    %18 = arith.mulf %16, %17 : vector<8x128xf32>
    %19 = arith.mulf %9, %18 : vector<8x128xf32>
    %20 = vector.broadcast %5 : vector<1x128xf32> to vector<8x128xf32>
    %21 = arith.addf %19, %20 : vector<8x128xf32>
    %c0_11 = arith.constant 0 : index
    %c0_12 = arith.constant 0 : index
    %22 = vector.load %arg6[%c0_11, %c0_12] : memref<8x128xf32, #tpu.memory_space<vmem>>, vector<8x128xf32>
    tpu.vector_store %arg6[%c0_11, %c0_12], %21 {strides = array<i32>} : memref<8x128xf32, #tpu.memory_space<vmem>>, vector<8x128xf32>,
    %c0_13 = arith.constant 0 : index
    %c0_14 = arith.constant 0 : index
    %23 = vector.load %arg2[%c0_13, %c0_14] : memref<8x128xf32, #tpu.memory_space<vmem>>, vector<8x128xf32>
    %24 = vector.extract_strided_slice %0 {offsets = [1, 0], sizes = [1, 128], strides = [1, 1]} : vector<2x128xf32> to vector<1x128xf32>
    %25 = vector.extract_strided_slice %1 {offsets = [1, 0], sizes = [1, 128], strides = [1, 1]} : vector<2x128xf32> to vector<1x128xf32>
    %cst_15 = arith.constant dense<0.000000e+00> : vector<8x128xf32>
    %26 = tpu.matmul %23, %2, %cst_15 {dimension_numbers = #tpu.dot_dimension_numbers<[1], [0], [0], [1], [0, 0, 1, 1], [], []>, precision = #tpu.contract_precision<fp32>} : vector<8x128xf32>, vector<128x128xf32>, vector<8x128xf32> -> vector<8x128xf32>
    %cst_16 = arith.constant 3.125000e-02 : f32
    %27 = vector.broadcast %cst_16 : f32 to vector<8x128xf32>
    %28 = arith.mulf %26, %27 : vector<8x128xf32>
    %29 = arith.subf %23, %28 : vector<8x128xf32>
    %30 = arith.mulf %29, %29 : vector<8x128xf32>
    %cst_17 = arith.constant dense<0.000000e+00> : vector<8x128xf32>
    %31 = tpu.matmul %30, %2, %cst_17 {dimension_numbers = #tpu.dot_dimension_numbers<[1], [0], [0], [1], [0, 0, 1, 1], [], []>, precision = #tpu.contract_precision<fp32>} : vector<8x128xf32>, vector<128x128xf32>, vector<8x128xf32> -> vector<8x128xf32>
    %cst_18 = arith.constant 3.125000e-02 : f32
    %32 = vector.broadcast %cst_18 : f32 to vector<8x128xf32>
    %33 = arith.mulf %31, %32 : vector<8x128xf32>
    %cst_19 = arith.constant 9.99999997E-7 : f32
    %34 = vector.broadcast %cst_19 : f32 to vector<8x128xf32>
    %35 = arith.addf %33, %34 : vector<8x128xf32>
    %36 = math.rsqrt %35 : vector<8x128xf32>
    %37 = vector.broadcast %24 : vector<1x128xf32> to vector<8x128xf32>
    %38 = arith.mulf %36, %37 : vector<8x128xf32>
    %39 = arith.mulf %29, %38 : vector<8x128xf32>
    %40 = vector.broadcast %25 : vector<1x128xf32> to vector<8x128xf32>
    %41 = arith.addf %39, %40 : vector<8x128xf32>
    %c0_20 = arith.constant 0 : index
    %c0_21 = arith.constant 0 : index
    %42 = vector.load %arg7[%c0_20, %c0_21] : memref<8x128xf32, #tpu.memory_space<vmem>>, vector<8x128xf32>
    tpu.vector_store %arg7[%c0_20, %c0_21], %41 {strides = array<i32>} : memref<8x128xf32, #tpu.memory_space<vmem>>, vector<8x128xf32>,
    return
  }
  func.func @transform_0(%arg0: i32) -> (i32, i32) {
    %c0_i32 = arith.constant 0 : i32
    %c0_i32_0 = arith.constant 0 : i32
    return %arg0, %c0_i32 : i32, i32
  }
  func.func @transform_1(%arg0: i32) -> (i32, i32) {
    %c0_i32 = arith.constant 0 : i32
    %c0_i32_0 = arith.constant 0 : i32
    return %arg0, %c0_i32 : i32, i32
  }
  func.func @transform_2(%arg0: i32) -> (i32, i32) {
    %c0_i32 = arith.constant 0 : i32
    %c0_i32_0 = arith.constant 0 : i32
    %c0_i32_1 = arith.constant 0 : i32
    return %c0_i32, %c0_i32_0 : i32, i32
  }
  func.func @transform_3(%arg0: i32) -> (i32, i32) {
    %c0_i32 = arith.constant 0 : i32
    %c0_i32_0 = arith.constant 0 : i32
    %c0_i32_1 = arith.constant 0 : i32
    return %c0_i32, %c0_i32_0 : i32, i32
  }
  func.func @transform_4(%arg0: i32) -> (i32, i32) {
    %c0_i32 = arith.constant 0 : i32
    %c0_i32_0 = arith.constant 0 : i32
    %c0_i32_1 = arith.constant 0 : i32
    return %c0_i32, %c0_i32_0 : i32, i32
  }
  func.func @transform_5(%arg0: i32) -> (i32, i32) {
    %c0_i32 = arith.constant 0 : i32
    %c0_i32_0 = arith.constant 0 : i32
    return %arg0, %c0_i32 : i32, i32
  }
  func.func @transform_6(%arg0: i32) -> (i32, i32) {
    %c0_i32 = arith.constant 0 : i32
    %c0_i32_0 = arith.constant 0 : i32
    return %arg0, %c0_i32 : i32, i32
  }
}

</mosaic_0001>

<bundles_post_ra>
// kernel: tpu_custom_call.1
= control target key start
LH: loop header
LB: loop body
LE: loop exit
PB: predicated region body
PF: predicated region fallthrough
CT: control target
= control target key end

     0   :  { %s6011_s0 = inlined_call_operand.hbm [shape: f32[32,128], index: 0, kind: input, shape index: {}]   ;;  %s6012_s1 = inlined_call_operand.hbm [shape: f32[32,128], index: 1, kind: input, shape index: {}]   ;;  %s6013_s2 = inlined_call_operand.vmem [shape: f32[2,128], index: 2, kind: input, shape index: {}]   ;;  %s6014_s3 = inlined_call_operand.vmem [shape: f32[2,128], index: 3, kind: input, shape index: {}]   ;;  %s6015_s4 = inlined_call_operand.hbm [shape: f32[128,128], index: 4, kind: input, shape index: {}]   ;;  %s6016_s5 = inlined_call_operand.hbm [shape: f32[32,128], index: 5, kind: output, shape index: {0}]   ;;  %s6017_s6 = inlined_call_operand.hbm [shape: f32[32,128], index: 6, kind: output, shape index: {1}]  }
   0x1   :  { %6076 = sst [smem:[#allocation40_spill]] %s6015_s4 }
   0x2   :  { %12 = vsyncpa [#allocation3], 0 }
   0x3   :  { %14 = vsyncpa [#allocation3 + $0x1], 0 }
   0x4   :  { %15 = vsyncpa [#allocation6], 0 }
   0x5   :  { %17 = vsyncpa [#allocation6 + $0x1], 0 }
   0x6   :  { %18 = vsyncpa [#allocation4], 0 }
   0x7   :  { %20 = vsyncpa [#allocation4 + $0x1], 0 }
   0x8   :  { %21 = vsyncpa [#allocation10], 0 }
   0x9   :  { %23 = vsyncpa [#allocation10 + $0x1], 0  ;;  %s4688_s21 = smov 0   ;;  %s4690_s22 = smov 0  }
   0xa   :  { %s4692_s23 = smov 0   ;;  %s4694_s24 = smov 0  }
   0xb LB: > { %6077 = sst [smem:[#allocation16_spill]] %s4638_s23  ;;  %s4709_s25 = sadd.s32 4294967295, %s4642_s24   ;;  %s4642_s24 = sphi %s4694_s24, %s6171_s24   ;;  %s4638_s23 = sphi %s4692_s23, %s6168_s23   ;;  %s4634_s22 = sphi %s4690_s22, %s6170_s22   ;;  %s4630_s21 = sphi %s4688_s21, %s6169_s21  }
   0xc   : > { %s3115_s26 = sadd.s32 4294967294, %s4642_s24   ;;  %p49_p0 = scmp.ne.s32.totalorder %s4634_s22, %s4630_s21 }
   0xd   : > { %p6019_p1 = scmp.eq.s32.totalorder %s4709_s25, 0  ;;  %p168_p3 = scmp.eq.s32.totalorder %s3115_s26, 3 }
   0xe   : > { %p3116_p5 = scmp.ge.s32.totalorder %s4642_s24, 1  ;;  %p201_p7 = scmp.lt.s32.totalorder %s4642_s24, 5 }
   0xf   : > { %p4718_p4 = por %p6019_p1, %p49_p0  ;;  %p4723_p6 = por %p168_p3, %p49_p0 }
  0x10   : > { %p4728_p8 = pnand %p3116_p5, %p201_p7  ;;  %s4644_s30 = smov [#allocation7]  }
  0x11   : > { %s6078_s27 = scalar_select %p4718_p4, 1, 0 }
  0x12   : > { %s6079_s28 = scalar_select %p4723_p6, 1, 0 }
  0x13   : > { %s6080_s29 = scalar_select %p4728_p8, 1, 0 }
  0x14   : > { %s219_s7 = sshll.u32 %s4644_s30, 4  ;;  %p4395_p9 = pneg %p4728_p8  ;;  %s220_s7 = int_to_ptr.vmem [resolvable:$true] %s219_s7 }
  0x15   : > { %s4741_s9 = sadd.s32 1, %s4642_s24   ;;  %s36_s10 = sadd.s32 1, %s4638_s23 }
  0x16   : > { %p4736_p10 = pnand %p4395_p9, %p6019_p1  ;;  %s33_s11 = ssub.s32 %s4642_s24, %s4741_s9 }
  0x17   : > { %s4469_s12 = scalar_lea.vmem %s220_s7, 2048  ;;  %p4477_p3 = scmp.lt.s32.totalorder %s220_s7, %s220_s7 }
  0x18   : > { %p4460_p11 = pneg %p4736_p10  ;;  %p4470_p12 = scmp.ne.s32.totalorder %s220_s7, %s4469_s12 }
  0x19   : > { %p4478_p5 = scmp.lt.s32.totalorder %s4469_s12, %s4469_s12 }
  0x1a   : > { %p4472_p13 = pnand %p4470_p12, %p4460_p11 }
  0x1b   : > { %p4479_p7 = por %p4478_p5, %p4477_p3 }
  0x1c   : > { %p4473_p0 = pneg %p4472_p13 }
  0x1e   : > { %p4480_p2 = pnand %p4479_p7, %p4473_p0 }
  0x20   : > { %4483 = shalt.err (!%p4480_p2)
}
  0x21   : > { %s4645_s13 = smov 128   ;;  %s4646_s14 = smov 8  }
  0x22   : > { %s6082_s4 = sld [smem:[#allocation40_spill]]  ;;  %p34_p9 = scmp.eq.s32.totalorder %s33_s11, 0 }
  0x23   : > { %p43_p11 = scmp.ne.s32.totalorder %s4638_s23, %s4634_s22  ;;  %p44_p12 = scmp.eq.s32.totalorder %s4642_s24, 0 }
  0x24   : > { %p4414_p2 = scmp.lt.s32.totalorder %s4642_s24, 4  ;;  %p6084_p0 = scmp.eq.s32.totalorder %s4709_s25, 3 }
  0x25   : > { %s4758_s17 = scalar_select %p34_p9, %s4638_s23, %s36_s10  }
  0x26   : > { %p45_p13 = por %p44_p12, %p43_p11  ;;  %p4762_p3 = por %p6084_p0, %p43_p11 }
  0x27   : > { %6083 = sst [smem:[#allocation17_spill]] %s4758_s17  ;;  %s233_s19 = sand.u32 1, %s4638_s23  }
  0x28   : > { %4398 = dma.hbm_to_vmem [thread:$0]  (!%p4736_p10), %s6082_s4, 2048, %s220_s7, [#allocation6], %s4645_s13, %s4645_s13, %s4646_s14  }
  0x29   : > { %s6085_s18 = scalar_select %p4762_p3, 1, 0 }
  0x2a   : > { %s3120_s20 = sshll.u32 %s4642_s24, 7  ;;  %s4768_s26 = sshll.u32 %s233_s19, 3 }
  0x2b   : > { %s4773_s7 = scalar_lea.hbm %s6011_s0, %s3120_s20  ;;  %s237_s10 = scalar_lea.vmem [#allocation2], %s4768_s26 }
  0x2c   : > { %s244_s11 = sshll.u32 %s237_s10, 4  ;;  %p4776_p10 = pnand %p4414_p2, %p45_p13  ;;  %s245_s11 = int_to_ptr.vmem [resolvable:$true] %s244_s11 }
  0x2d   : > { %s4783_s15 = scalar_lea.hbm %s6012_s1, %s3120_s20  ;;  %s234_s16 = scalar_lea.sflag [#allocation3], %s233_s19 }
  0x2e   : > { %s4484_s30 = scalar_lea.hbm %s4773_s7, 128  ;;  %p4486_p7 = pneg %p4776_p10 }
  0x2f   : > { %p4485_p5 = scmp.ne.s32.totalorder %s4773_s7, %s4484_s30  ;;  %s4489_s4 = scalar_lea.hbm %s6011_s0, 512 }
  0x30   : > { %p4490_p12 = scmp.lt.s32.totalorder %s4773_s7, %s6011_s0  ;;  %p4491_p2 = scmp.lt.s32.totalorder %s4489_s4, %s4484_s30 }
  0x31   : > { %p4487_p9 = pnand %p4486_p7, %p4485_p5 }
  0x32   : > { %p4492_p13 = por %p4491_p2, %p4490_p12 }
  0x33   : > { %p4488_p11 = pneg %p4487_p9 }
  0x35   : > { %p4493_p0 = pnand %p4492_p13, %p4488_p11 }
  0x37   : > { %4496 = shalt.err (!%p4493_p0)
}
  0x38   : > { %s4497_s19 = scalar_lea.vmem %s245_s11, 128  ;;  %s4647_s20 = smov [#allocation2]  }
  0x39   : > { %p4498_p1 = scmp.ne.s32.totalorder %s245_s11, %s4497_s19  ;;  %s4502_s13 = sshll.u32 %s4647_s20, 4  ;;  %s4503_s13 = int_to_ptr.vmem [resolvable:$false] %s4502_s13 }
  0x3a   : > { %s4504_s14 = scalar_lea.vmem %s4503_s13, 256  ;;  %p4505_p9 = scmp.lt.s32.totalorder %s245_s11, %s4503_s13 }
  0x3b   : > { %p4500_p6 = pnand %p4498_p1, %p4486_p7  ;;  %p4506_p3 = scmp.lt.s32.totalorder %s4504_s14, %s4497_s19 }
  0x3d   : > { %p4501_p5 = pneg %p4500_p6  ;;  %p4507_p4 = por %p4506_p3, %p4505_p9 }
  0x3f   : > { %p4508_p8 = pnand %p4507_p4, %p4501_p5 }
  0x41   : > { %4511 = shalt.err (!%p4508_p8)
}
  0x42   : > { %4402 = dma.hbm_to_vmem [thread:$0]  (!%p4776_p10), %s4773_s7, 128, %s245_s11, %s234_s16  }
  0x43   : > { %s251_s4 = sand.u32 1, %s4642_s24   ;;  %s255_s23 = scalar_lea.vmem [#allocation5], %s4768_s26 }
  0x44   : > { %s262_s17 = sshll.u32 %s255_s23, 4  ;;  %s252_s30 = scalar_lea.sflag [#allocation6], %s251_s4  ;;  %s263_s17 = int_to_ptr.vmem [resolvable:$true] %s262_s17 }
  0x45   : > { %s4512_s8 = scalar_lea.hbm %s4783_s15, 128  ;;  %s4517_s20 = scalar_lea.hbm %s6012_s1, 512 }
  0x46   : > { %p4513_p1 = scmp.ne.s32.totalorder %s4783_s15, %s4512_s8  ;;  %p4518_p8 = scmp.lt.s32.totalorder %s4783_s15, %s6012_s1 }
  0x47   : > { %p4519_p3 = scmp.lt.s32.totalorder %s4517_s20, %s4512_s8 }
  0x48   : > { %p4515_p4 = pnand %p4513_p1, %p4486_p7 }
  0x49   : > { %p4520_p11 = por %p4519_p3, %p4518_p8 }
  0x4a   : > { %p4516_p6 = pneg %p4515_p4 }
  0x4c   : > { %p4521_p12 = pnand %p4520_p11, %p4516_p6 }
  0x4e   : > { %4524 = shalt.err (!%p4521_p12)
}
  0x4f   : > { %s4525_s26 = scalar_lea.vmem %s263_s17, 128  ;;  %s4648_s7 = smov [#allocation5]  }
  0x50   : > { %p4526_p2 = scmp.ne.s32.totalorder %s263_s17, %s4525_s26  ;;  %s4530_s11 = sshll.u32 %s4648_s7, 4  ;;  %s4531_s11 = int_to_ptr.vmem [resolvable:$false] %s4530_s11 }
  0x51   : > { %s4532_s16 = scalar_lea.vmem %s4531_s11, 256  ;;  %p4533_p5 = scmp.lt.s32.totalorder %s263_s17, %s4531_s11 }
  0x52   : > { %p4528_p13 = pnand %p4526_p2, %p4486_p7  ;;  %p4534_p9 = scmp.lt.s32.totalorder %s4532_s16, %s4525_s26 }
  0x54   : > { %p4529_p0 = pneg %p4528_p13  ;;  %p4535_p1 = por %p4534_p9, %p4533_p5 }
  0x56   : > { %p4536_p4 = pnand %p4535_p1, %p4529_p0 }
  0x58   : > { %4539 = shalt.err (!%p4536_p4)
}
  0x59   : > { %4405 = dma.hbm_to_vmem [thread:$0]  (!%p4776_p10), %s4783_s15, 128, %s263_s17, %s252_s30  }
  0x5a   : > { %p6087_p6 = scmp.ne.s32.totalorder %s6080_s29, 0 }
  0x5c   : > { %271 = sbr.rel (%p6087_p6) target bundleno = 1105 (0x451), region = 40 }
  0x61   : > { %s4828_s4 = sand.u32 1, %s4634_s22   ;;  %p6088_p7 = scmp.ne.s32.totalorder %s6078_s27, 0 }
  0x62   : > { %s4831_s23 = sshll.u32 %s4828_s4, 3  ;;  %s274_s8 = scalar_lea.sflag [#allocation3], %s4828_s4 }
  0x63   : > { %s277_s10 = scalar_lea.vmem [#allocation2], %s4831_s23 }
  0x64   : > { %4609 = dma.done.wait (%p6088_p7), %s274_s8, 128  }
  0x65   : > { %4611 = vsyncadd (%p6088_p7), %s274_s8, 4294967168  ;;  %s282_s29 = sand.u32 1, %s4709_s25   ;;  %s286_s15 = scalar_lea.vmem [#allocation5], %s4831_s23 }
  0x66   : > { %s283_s12 = scalar_lea.sflag [#allocation6], %s282_s29 }
  0x67   : > { %4613 = dma.done.wait (%p6088_p7), %s283_s12, 128  }
  0x68   : > { %4615 = vsyncadd (%p6088_p7), %s283_s12, 4294967168  ;;  %p6089_p10 = scmp.eq.s32.totalorder %s4709_s25, 0 }
  0x6a   : > { %4617 = dma.done.wait (%p6089_p10), [#allocation6], 2048   ;;  %p6090_p8 = pmov %p6089_p10 }
  0x6b   : > { %v6064_v0 = vmov 0.0   ;;  %vm4650_vm0 = vmmov 0   ;;  %v346_v1 = vld [vmem:[#allocation7 + $0x78] sm:$0xff]  ;;  %v345_v2 = vld [vmem:[#allocation7 + $0x70] sm:$0xff]  ;;  %v344_v3 = vld [vmem:[#allocation7 + $0x68] sm:$0xff]  ;;  %s321_s20 = scalar_lea.vmem [#allocation8], %s4831_s23 }
  0x6c   : > { %4619 = vsyncadd (%p6090_p8), [#allocation6], 4294965248  ;;  %3543 = vmatprep.subr.mxu0 %v6064_v0  ;;  %3578 = vmatprep.subr.mxu1 %v6064_v0  ;;  %v4855_v4 = vand.u32 4294901760, %v346_v1  ;;  %v4857_v5 = vand.u32 4294901760, %v345_v2  ;;  %v4859_v6 = vand.u32 4294901760, %v344_v3  ;;  %v343_v7 = vld [vmem:[#allocation7 + $0x60] sm:$0xff] }
  0x6d   : > { %3575 = vmatprep.mubr.msk.f32.mxu0 %vm4650_vm0, %v6064_v0  ;;  %3610 = vmatprep.mubr.msk.f32.mxu1 %vm4650_vm0, %v6064_v0  ;;  %v342_v8 = vld [vmem:[#allocation7 + $0x58] sm:$0xff]  ;;  %v341_v9 = vld [vmem:[#allocation7 + $0x50] sm:$0xff]  ;;  %v4861_v10 = vand.u32 4294901760, %v343_v7  ;;  %v340_v13 = vld [vmem:[#allocation7 + $0x48] sm:$0xff]  ;;  %s3131_s13 = sshll.u32 %s4709_s25, 7  ;;  %s2968_s11 = sshll.u32 %s321_s20, 4  ;;  %s2969_s11 = int_to_ptr.vmem [resolvable:$true] %s2968_s11 }
  0x6e   : > { %v4863_v11 = vand.u32 4294901760, %v342_v8  ;;  %v4865_v12 = vand.u32 4294901760, %v341_v9  ;;  %v339_v14 = vld [vmem:[#allocation7 + $0x40] sm:$0xff]  ;;  %3544 = vmatpush3.msra.mxu0 %v4855_v4  ;;  %v4869_v15 = vsub.f32 %v346_v1, %v4855_v4  ;;  %v4872_v16 = vsub.f32 %v345_v2, %v4857_v5  ;;  %v338_v19 = vld [vmem:[#allocation7 + $0x38] sm:$0xff]  ;;  %v337_v26 = vld [vmem:[#allocation7 + $0x30] sm:$0xff]  ;;  %s2966_s7 = scalar_lea.hbm %s6016_s5, %s3131_s13  ;;  %s2950_s16 = scalar_lea.sflag [#allocation4], %s4828_s4 }
  0x6f   : > { %v4874_v17 = vand.u32 4294901760, %v340_v13  ;;  %v4877_v18 = vsub.f32 %v344_v3, %v4859_v6  ;;  %3545 = vmatprep.subr.mxu0 %v6064_v0  ;;  %v4881_v20 = vsub.f32 %v343_v7, %v4861_v10  ;;  %v4896_v25 = vand.u32 4294901760, %v339_v14  ;;  %v336_v36 = vld [vmem:[#allocation7 + $0x28] sm:$0xff]  ;;  %v335_v41 = vld [vmem:[#allocation7 + $0x20] sm:$0xff]  ;;  %v334_v49 = vld [vmem:[#allocation7 + $0x18] sm:$0xff]  ;;  %s4540_s8 = scalar_lea.vmem %s2969_s11, 128 }
  0x70   : > { %v4884_v21 = vsub.f32 %v342_v8, %v4863_v11  ;;  %3546 = vmatpush3.msra.mxu0 %v4857_v5  ;;  %v4888_v22 = vand.u32 4294901760, %v4869_v15  ;;  %v4891_v23 = vand.u32 4294901760, %v4872_v16  ;;  %v4902_v28 = vand.u32 4294901760, %v338_v19  ;;  %v4957_v50 = vld [vmem:[%s277_s10] sm:$0xff]  ;;  %v333_v54 = vld [vmem:[#allocation7 + $0x10] sm:$0xff]  ;;  %p4541_p3 = scmp.ne.s32.totalorder %s2969_s11, %s4540_s8  ;;  %p6162_p11 = scmp.ne.s32.totalorder %s6085_s18, 0 }
  0x71   : > { %v4894_v24 = vand.u32 4294901760, %v4877_v18  ;;  %3547 = vmatprep.subr.mxu0 %v6064_v0  ;;  %v4900_v27 = vand.u32 4294901760, %v4881_v20  ;;  %v4908_v30 = vsub.f32 %v341_v9, %v4865_v12  ;;  %v4918_v34 = vsub.f32 %v340_v13, %v4874_v17  ;;  %6094 = vst [vmem:[#allocation21_spill] sm:$0xff] %v4957_v50  ;;  %v332_v60 = vld [vmem:[#allocation7 + $0x8] sm:$0xff]  ;;  %v331_v7 = vld [vmem:[#allocation7] sm:$0xff]  ;;  %s4651_s10 = smov [#allocation8]  }
  0x72   : > { %v4905_v29 = vand.u32 4294901760, %v4884_v21  ;;  %3548 = vmatpush3.msra.mxu0 %v4859_v6  ;;  %v443_v31 = vsub.f32 %v4869_v15, %v4888_v22  ;;  %v450_v32 = vsub.f32 %v4872_v16, %v4891_v23  ;;  %v4921_v35 = vand.u32 4294901760, %v337_v26  ;;  %p4542_p12 = pnand %p4541_p3, %p6162_p11  ;;  %s4544_s29 = sshll.u32 %s4651_s10, 4  ;;  %s4545_s29 = int_to_ptr.vmem [resolvable:$false] %s4544_s29 }
  0x73   : > { %v457_v33 = vsub.f32 %v4877_v18, %v4894_v24  ;;  %3549 = vmatprep.subr.mxu0 %v6064_v0  ;;  %v464_v39 = vsub.f32 %v4881_v20, %v4900_v27  ;;  %v4931_v40 = vand.u32 4294901760, %v4908_v30  ;;  %v4937_v43 = vsub.f32 %v339_v14, %v4896_v25  ;;  %s4546_s12 = scalar_lea.vmem %s4545_s29, 256  ;;  %p4547_p13 = scmp.lt.s32.totalorder %s2969_s11, %s4545_s29 }
  0x74   : > { %3550 = vmatpush3.msra.mxu0 %v4861_v10  ;;  %v4924_v37 = vand.u32 4294901760, %v443_v31  ;;  %v4926_v38 = vand.u32 4294901760, %v450_v32  ;;  %v471_v42 = vsub.f32 %v4884_v21, %v4905_v29  ;;  %v4943_v45 = vand.u32 4294901760, %v336_v36  ;;  %p4543_p2 = pneg %p4542_p12  ;;  %p4548_p0 = scmp.lt.s32.totalorder %s4546_s12, %s4540_s8 }
  0x75   : > { %3551 = vmatprep.subr.mxu0 %v6064_v0  ;;  %v4941_v44 = vand.u32 4294901760, %v457_v33  ;;  %v4946_v46 = vand.u32 4294901760, %v4918_v34  ;;  %v4949_v47 = vsub.f32 %v338_v19, %v4902_v28  ;;  %v4953_v48 = vand.u32 4294901760, %v335_v41 }
  0x76   : > { %6091 = vst [vmem:[#allocation18_spill] sm:$0xff] %v4924_v37  ;;  %6092 = vst [vmem:[#allocation19_spill] sm:$0xff] %v4926_v38  ;;  %3552 = vmatpush3.msra.mxu0 %v4863_v11  ;;  %3579 = vmatpush3.msra.mxu1 %v4924_v37  ;;  %v4961_v51 = vand.u32 4294901760, %v464_v39  ;;  %v478_v52 = vsub.f32 %v4908_v30, %v4931_v40  ;;  %v4966_v53 = vand.u32 4294901760, %v4937_v43  ;;  %v4973_v56 = vand.u32 4294901760, %v471_v42  ;;  %p4549_p5 = por %p4548_p0, %p4547_p13 }
  0x77   : > { %6093 = vst [vmem:[#allocation20_spill] sm:$0xff] %v4941_v44  ;;  %3553 = vmatprep.subr.mxu0 %v6064_v0  ;;  %3580 = vmatprep.subr.mxu1 %v6064_v0  ;;  %v4969_v55 = vsub.f32 %v337_v26, %v4921_v35  ;;  %v4976_v57 = vand.u32 4294901760, %v4949_v47  ;;  %v485_v58 = vsub.f32 %v4918_v34, %v4946_v46  ;;  %v4982_v59 = vand.u32 4294901760, %v334_v49 }
  0x78   : > { %3554 = vmatpush3.msra.mxu0 %v4865_v12  ;;  %3581 = vmatpush3.msra.mxu1 %v4926_v38  ;;  %6095 = vst [vmem:[#allocation22_spill] sm:$0xff] %v4961_v51  ;;  %6096 = vst [vmem:[#allocation23_spill] sm:$0xff] %v4973_v56  ;;  %v4985_v61 = vsub.f32 %v336_v36, %v4943_v45  ;;  %v4988_v62 = vand.u32 4294901760, %v4957_v50  ;;  %v4992_v63 = vand.u32 4294901760, %v333_v54  ;;  %v4996_v1 = vand.u32 4294901760, %v478_v52  ;;  %p4550_p9 = pnand %p4549_p5, %p4543_p2 }
  0x79   : > { %3555 = vmatprep.subr.mxu0 %v6064_v0  ;;  %3582 = vmatprep.subr.mxu1 %v6064_v0  ;;  %v492_v2 = vsub.f32 %v4937_v43, %v4966_v53  ;;  %v5001_v3 = vand.u32 4294901760, %v4969_v55  ;;  %v5004_v8 = vsub.f32 %v335_v41, %v4953_v48  ;;  %v499_v9 = vsub.f32 %v4949_v47, %v4976_v57 }
  0x7a   : > { %3556 = vmatpush3.msra.mxu0 %v4874_v17  ;;  %3583 = vmatpush3.msra.mxu1 %v4941_v44  ;;  %6097 = vst [vmem:[#allocation24_spill] sm:$0xff] %v4996_v1  ;;  %v5010_v13 = vand.u32 4294901760, %v332_v60  ;;  %v5014_v14 = vand.u32 4294901760, %v485_v58  ;;  %v5017_v19 = vand.u32 4294901760, %v4985_v61  ;;  %v5021_v26 = vsub.f32 %v4957_v50, %v4988_v62 }
  0x7b   : > { %3557 = vmatprep.subr.mxu0 %v6064_v0  ;;  %3584 = vmatprep.subr.mxu1 %v6064_v0  ;;  %v5024_v31 = vsub.f32 %v334_v49, %v4982_v59  ;;  %v5028_v32 = vand.u32 4294901760, %v331_v7  ;;  %v5032_v33 = vand.u32 4294901760, %v492_v2  ;;  %v506_v36 = vsub.f32 %v4969_v55, %v5001_v3 }
  0x7c   : > { %3558 = vmatpush3.msra.mxu0 %v4896_v25  ;;  %3585 = vmatpush3.msra.mxu1 %v4961_v51  ;;  %6098 = vst [vmem:[#allocation25_spill] sm:$0xff] %v5014_v14  ;;  %v5037_v39 = vand.u32 4294901760, %v5004_v8  ;;  %v5040_v41 = vsub.f32 %v333_v54, %v4992_v63  ;;  %v5044_v42 = vand.u32 4294901760, %v499_v9  ;;  %v513_v49 = vsub.f32 %v4985_v61, %v5017_v19 }
  0x7d   : > { %3559 = vmatprep.subr.mxu0 %v6064_v0  ;;  %3586 = vmatprep.subr.mxu1 %v6064_v0  ;;  %6099 = vst [vmem:[#allocation26_spill] sm:$0xff] %v5032_v33  ;;  %v5052_v58 = vand.u32 4294901760, %v5024_v31  ;;  %v5055_v54 = vsub.f32 %v332_v60, %v5010_v13  ;;  %v5061_v2 = vand.u32 4294901760, %v506_v36  ;;  %v5069_v50 = vsub.f32 %v331_v7, %v5028_v32 }
  0x7e   : > { %3560 = vmatpush3.msra.mxu0 %v4902_v28  ;;  %3587 = vmatpush3.msra.mxu1 %v4973_v56  ;;  %6100 = vst [vmem:[#allocation27_spill] sm:$0xff] %v5037_v39  ;;  %6101 = vst [vmem:[#allocation28_spill] sm:$0xff] %v5044_v42  ;;  %v520_v9 = vsub.f32 %v5004_v8, %v5037_v39  ;;  %v5066_v52 = vand.u32 4294901760, %v5040_v41  ;;  %v5075_v60 = vand.u32 4294901760, %v513_v49  ;;  %v6106_v36 = vand.u32 4294901760, %v5021_v26 }
  0x7f   : > { %3561 = vmatprep.subr.mxu0 %v6064_v0  ;;  %3588 = vmatprep.subr.mxu1 %v6064_v0  ;;  %6102 = vst [vmem:[#allocation29_spill] sm:$0xff] %v5052_v58  ;;  %6103 = vst [vmem:[#allocation30_spill] sm:$0xff] %v5061_v2  ;;  %v5083_v7 = vand.u32 4294901760, %v5055_v54 }
  0x80   : > { %3562 = vmatpush3.msra.mxu0 %v4921_v35  ;;  %3589 = vmatpush3.msra.mxu1 %v4996_v1  ;;  %6104 = vst [vmem:[#allocation31_spill] sm:$0xff] %v5066_v52  ;;  %6105 = vst [vmem:[#allocation32_spill] sm:$0xff] %v5075_v60  ;;  %v5089_v49 = vand.u32 4294901760, %v520_v9 }
  0x81   : > { %3563 = vmatprep.subr.mxu0 %v6064_v0  ;;  %3590 = vmatprep.subr.mxu1 %v6064_v0  ;;  %6107 = vst [vmem:[#allocation33_spill] sm:$0xff] %v5083_v7  ;;  %v541_v9 = vsub.f32 %v5055_v54, %v5083_v7 }
  0x82   : > { %3564 = vmatpush3.msra.mxu0 %v4943_v45  ;;  %3591 = vmatpush3.msra.mxu1 %v5014_v14  ;;  %v527_v14 = vsub.f32 %v5024_v31, %v5052_v58  ;;  %6108 = vst [vmem:[#allocation34_spill] sm:$0xff] %v5089_v49 }
  0x83   : > { %3565 = vmatprep.subr.mxu0 %v6064_v0  ;;  %3592 = vmatprep.subr.mxu1 %v6064_v0 }
  0x84   : > { %3566 = vmatpush3.msra.mxu0 %v4953_v48  ;;  %3593 = vmatpush3.msra.mxu1 %v5032_v33  ;;  %v432_v33 = vsub.f32 %v5021_v26, %v6106_v36  ;;  %v5094_v36 = vand.u32 4294901760, %v5069_v50  ;;  %v5100_v56 = vand.u32 4294901760, %v527_v14  ;;  %v5115_v14 = vand.u32 4294901760, %v541_v9  ;;  %v6119_v9 = vld [vmem:[#allocation26_spill] sm:$0xff] }
  0x85   : > { %3567 = vmatprep.subr.mxu0 %v6064_v0  ;;  %3594 = vmatprep.subr.mxu1 %v6064_v0 }
  0x86   : > { %3568 = vmatpush3.msra.mxu0 %v4982_v59  ;;  %3595 = vmatpush3.msra.mxu1 %v5044_v42  ;;  %v534_v42 = vsub.f32 %v5040_v41, %v5066_v52  ;;  %6109 = vst [vmem:[#allocation35_spill] sm:$0xff] %v5094_v36  ;;  %v433_v1 = vand.u32 4294901760, %v432_v33  ;;  %6110 = vst [vmem:[#allocation36_spill] sm:$0xff] %v5100_v56  ;;  %v548_v51 = vsub.f32 %v5069_v50, %v5094_v36 }
  0x87   : > { %3569 = vmatprep.subr.mxu0 %v6064_v0  ;;  %3596 = vmatprep.subr.mxu1 %v6064_v0  ;;  %6112 = vst [vmem:[#allocation38_spill] sm:$0xff] %v5115_v14 }
  0x88   : > { %3570 = vmatpush3.msra.mxu0 %v4992_v63  ;;  %3597 = vmatpush3.msra.mxu1 %v5061_v2  ;;  %v5108_v2 = vand.u32 4294901760, %v534_v42  ;;  %v5121_v33 = vand.u32 4294901760, %v548_v51  ;;  %v6114_v51 = vand.u32 4294901760, %v5021_v26  ;;  %v6118_v42 = vld [vmem:[#allocation25_spill] sm:$0xff] }
  0x89   : > { %3571 = vmatprep.subr.mxu0 %v6064_v0  ;;  %3598 = vmatprep.subr.mxu1 %v6064_v0 }
  0x8a   : > { %3572 = vmatpush3.msra.mxu0 %v5010_v13  ;;  %3599 = vmatpush3.msra.mxu1 %v5075_v60  ;;  %6111 = vst [vmem:[#allocation37_spill] sm:$0xff] %v5108_v2  ;;  %6113 = vst [vmem:[#allocation39_spill] sm:$0xff] %v5121_v33 }
  0x8b   : > { %3573 = vmatprep.subr.mxu0 %v6064_v0  ;;  %3600 = vmatprep.subr.mxu1 %v6064_v0 }
  0x8c   : > { %3574 = vmatpush3.msra.mxu0 %v5028_v32  ;;  %3601 = vmatpush3.msra.mxu1 %v5089_v49 }
  0x8d   : > { %3602 = vmatprep.subr.mxu1 %v6064_v0  ;;  %3613 = vmatprep.subr.mxu0 %v6064_v0 }
  0x8e   : > { %3576 = vmatmul.mubr.f32.vlgmr.msra.gmra.mxu0 %v433_v1  ;;  %3603 = vmatpush3.msra.mxu1 %v5100_v56  ;;  %v6116_v1 = vld [vmem:[#allocation23_spill] sm:$0xff] }
  0x8f   : > { %3614 = vmatpush3.msra.mxu0 %v4869_v15  ;;  %3604 = vmatprep.subr.mxu1 %v6064_v0 }
  0x90   : > { %3615 = vmatprep.subr.mxu0 %v6064_v0  ;;  %3605 = vmatpush3.msra.mxu1 %v5108_v2 }
  0x91   : > { %3616 = vmatpush3.msra.mxu0 %v4872_v16  ;;  %3606 = vmatprep.subr.mxu1 %v6064_v0 }
  0x92   : > { %3617 = vmatprep.subr.mxu0 %v6064_v0  ;;  %3607 = vmatpush3.msra.mxu1 %v5115_v14 }
  0x93   : > { %3618 = vmatpush3.msra.mxu0 %v4877_v18  ;;  %3608 = vmatprep.subr.mxu1 %v6064_v0 }
  0x94   : > { %3619 = vmatprep.subr.mxu0 %v6064_v0  ;;  %3609 = vmatpush3.msra.mxu1 %v5121_v33 }
  0x95   : > { %3620 = vmatpush3.msra.mxu0 %v4881_v20  ;;  %3611 = vmatmul.mubr.f32.vlgmr.msra.gmra.mxu1 %v4988_v62 }
  0x96   : > { %3621 = vmatprep.subr.mxu0 %v6064_v0  ;;  %3648 = vmatprep.subr.mxu1 %v6064_v0 }
  0x97   : > { %3622 = vmatpush3.msra.mxu0 %v4884_v21  ;;  %3649 = vmatpush3.msra.mxu1 %v4855_v4 }
  0x98   : > { %3623 = vmatprep.subr.mxu0 %v6064_v0  ;;  %3650 = vmatprep.subr.mxu1 %v6064_v0 }
  0x99   : > { %3624 = vmatpush3.msra.mxu0 %v4908_v30  ;;  %3651 = vmatpush3.msra.mxu1 %v4857_v5 }
  0x9a   : > { %3625 = vmatprep.subr.mxu0 %v6064_v0  ;;  %3652 = vmatprep.subr.mxu1 %v6064_v0 }
  0x9b   : > { %3626 = vmatpush3.msra.mxu0 %v4918_v34  ;;  %3653 = vmatpush3.msra.mxu1 %v4859_v6 }
  0x9c   : > { %3627 = vmatprep.subr.mxu0 %v6064_v0  ;;  %3654 = vmatprep.subr.mxu1 %v6064_v0 }
  0x9d   : > { %3628 = vmatpush3.msra.mxu0 %v4937_v43  ;;  %3655 = vmatpush3.msra.mxu1 %v4861_v10 }
  0x9e   : > { %3629 = vmatprep.subr.mxu0 %v6064_v0  ;;  %3656 = vmatprep.subr.mxu1 %v6064_v0 }
  0x9f   : > { %3630 = vmatpush3.msra.mxu0 %v4949_v47  ;;  %3657 = vmatpush3.msra.mxu1 %v4863_v11 }
  0xa0   : > { %3631 = vmatprep.subr.mxu0 %v6064_v0  ;;  %3658 = vmatprep.subr.mxu1 %v6064_v0 }
  0xa1   : > { %3632 = vmatpush3.msra.mxu0 %v4969_v55  ;;  %3659 = vmatpush3.msra.mxu1 %v4865_v12 }
  0xa2   : > { %3633 = vmatprep.subr.mxu0 %v6064_v0  ;;  %3660 = vmatprep.subr.mxu1 %v6064_v0 }
  0xa3   : > { %3634 = vmatpush3.msra.mxu0 %v4985_v61  ;;  %3661 = vmatpush3.msra.mxu1 %v4874_v17 }
  0xa4   : > { %3635 = vmatprep.subr.mxu0 %v6064_v0  ;;  %3662 = vmatprep.subr.mxu1 %v6064_v0 }
  0xa5   : > { %3636 = vmatpush3.msra.mxu0 %v5004_v8  ;;  %3663 = vmatpush3.msra.mxu1 %v4896_v25 }
  0xa6   : > { %3637 = vmatprep.subr.mxu0 %v6064_v0  ;;  %3664 = vmatprep.subr.mxu1 %v6064_v0 }
  0xa7   : > { %3638 = vmatpush3.msra.mxu0 %v5024_v31  ;;  %3665 = vmatpush3.msra.mxu1 %v4902_v28 }
  0xa8   : > { %3639 = vmatprep.subr.mxu0 %v6064_v0  ;;  %3666 = vmatprep.subr.mxu1 %v6064_v0 }
  0xa9   : > { %3640 = vmatpush3.msra.mxu0 %v5040_v41  ;;  %3667 = vmatpush3.msra.mxu1 %v4921_v35 }
  0xaa   : > { %3641 = vmatprep.subr.mxu0 %v6064_v0  ;;  %3668 = vmatprep.subr.mxu1 %v6064_v0 }
  0xab   : > { %3642 = vmatpush3.msra.mxu0 %v5055_v54  ;;  %3669 = vmatpush3.msra.mxu1 %v4943_v45 }
  0xac   : > { %3643 = vmatprep.subr.mxu0 %v6064_v0  ;;  %3670 = vmatprep.subr.mxu1 %v6064_v0 }
  0xad   : > { %3644 = vmatpush3.msra.mxu0 %v5069_v50  ;;  %3645 = vmatprep.mubr.msk.f32.mxu0 %vm4650_vm0, %v6064_v0 }
  0xae   : > { %3671 = vmatpush3.msra.mxu1 %v4953_v48  ;;  %3646 = vmatmul.mubr.f32.vlgmr.msra.gmra.mxu0 %v5021_v26  ;;  %v6117_v26 = vld [vmem:[#allocation24_spill] sm:$0xff] }
  0xaf   : > { %3672 = vmatprep.subr.mxu1 %v6064_v0  ;;  %3683 = vmatprep.subr.mxu0 %v6064_v0 }
  0xb0   : > { %3673 = vmatpush3.msra.mxu1 %v4982_v59  ;;  %3684 = vmatpush3.msra.mxu0 %v4888_v22 }
  0xb1   : > { %3674 = vmatprep.subr.mxu1 %v6064_v0  ;;  %3685 = vmatprep.subr.mxu0 %v6064_v0 }
  0xb2   : > { %3675 = vmatpush3.msra.mxu1 %v4992_v63  ;;  %3686 = vmatpush3.msra.mxu0 %v4891_v23 }
  0xb3   : > { %3676 = vmatprep.subr.mxu1 %v6064_v0  ;;  %3687 = vmatprep.subr.mxu0 %v6064_v0 }
  0xb4   : > { %3677 = vmatpush3.msra.mxu1 %v5010_v13  ;;  %3688 = vmatpush3.msra.mxu0 %v4894_v24 }
  0xb5   : > { %3678 = vmatprep.subr.mxu1 %v6064_v0  ;;  %3689 = vmatprep.subr.mxu0 %v6064_v0 }
  0xb6   : > { %3679 = vmatpush3.msra.mxu1 %v5028_v32  ;;  %3680 = vmatprep.mubr.msk.f32.mxu1 %vm4650_vm0, %v6064_v0 }
  0xb7   : > { %3690 = vmatpush3.msra.mxu0 %v4900_v27  ;;  %3681 = vmatmul.mubr.f32.vlgmr.msra.gmra.mxu1 %v6114_v51  ;;  %v6120_v51 = vld [vmem:[#allocation28_spill] sm:$0xff] }
  0xb8   : > { %3691 = vmatprep.subr.mxu0 %v6064_v0  ;;  %3718 = vmatprep.subr.mxu1 %v6064_v0 }
  0xb9   : > { %3692 = vmatpush3.msra.mxu0 %v4905_v29  ;;  %3719 = vmatpush3.msra.mxu1 %v4855_v4 }
  0xba   : > { %3693 = vmatprep.subr.mxu0 %v6064_v0  ;;  %3720 = vmatprep.subr.mxu1 %v6064_v0 }
  0xbb   : > { %3694 = vmatpush3.msra.mxu0 %v4931_v40  ;;  %3721 = vmatpush3.msra.mxu1 %v4857_v5 }
  0xbc   : > { %3695 = vmatprep.subr.mxu0 %v6064_v0  ;;  %3722 = vmatprep.subr.mxu1 %v6064_v0 }
  0xbd   : > { %3696 = vmatpush3.msra.mxu0 %v4946_v46  ;;  %3723 = vmatpush3.msra.mxu1 %v4859_v6 }
  0xbe   : > { %3697 = vmatprep.subr.mxu0 %v6064_v0  ;;  %3724 = vmatprep.subr.mxu1 %v6064_v0 }
  0xbf   : > { %3698 = vmatpush3.msra.mxu0 %v4966_v53  ;;  %3725 = vmatpush3.msra.mxu1 %v4861_v10 }
  0xc0   : > { %3699 = vmatprep.subr.mxu0 %v6064_v0  ;;  %3726 = vmatprep.subr.mxu1 %v6064_v0 }
  0xc1   : > { %3700 = vmatpush3.msra.mxu0 %v4976_v57  ;;  %3727 = vmatpush3.msra.mxu1 %v4863_v11 }
  0xc2   : > { %3701 = vmatprep.subr.mxu0 %v6064_v0  ;;  %3728 = vmatprep.subr.mxu1 %v6064_v0 }
  0xc3   : > { %3702 = vmatpush3.msra.mxu0 %v5001_v3  ;;  %3729 = vmatpush3.msra.mxu1 %v4865_v12 }
  0xc4   : > { %3703 = vmatprep.subr.mxu0 %v6064_v0  ;;  %3730 = vmatprep.subr.mxu1 %v6064_v0 }
  0xc5   : > { %3704 = vmatpush3.msra.mxu0 %v5017_v19  ;;  %3731 = vmatpush3.msra.mxu1 %v4874_v17 }
  0xc6   : > { %3705 = vmatprep.subr.mxu0 %v6064_v0  ;;  %3732 = vmatprep.subr.mxu1 %v6064_v0 }
  0xc7   : > { %3706 = vmatpush3.msra.mxu0 %v5037_v39  ;;  %3733 = vmatpush3.msra.mxu1 %v4896_v25 }
  0xc8   : > { %3707 = vmatprep.subr.mxu0 %v6064_v0  ;;  %3734 = vmatprep.subr.mxu1 %v6064_v0 }
  0xc9   : > { %3708 = vmatpush3.msra.mxu0 %v5052_v58  ;;  %3735 = vmatpush3.msra.mxu1 %v4902_v28  ;;  %v6122_v58 = vld [vmem:[#allocation21_spill] sm:$0xff] }
  0xca   : > { %3709 = vmatprep.subr.mxu0 %v6064_v0  ;;  %3736 = vmatprep.subr.mxu1 %v6064_v0 }
  0xcb   : > { %3710 = vmatpush3.msra.mxu0 %v5066_v52  ;;  %3737 = vmatpush3.msra.mxu1 %v4921_v35 }
  0xcc   : > { %3711 = vmatprep.subr.mxu0 %v6064_v0  ;;  %3738 = vmatprep.subr.mxu1 %v6064_v0 }
  0xcd   : > { %3712 = vmatpush3.msra.mxu0 %v5083_v7  ;;  %3739 = vmatpush3.msra.mxu1 %v4943_v45 }
  0xce   : > { %3713 = vmatprep.subr.mxu0 %v6064_v0  ;;  %3740 = vmatprep.subr.mxu1 %v6064_v0 }
  0xcf   : > { %3714 = vmatpush3.msra.mxu0 %v5094_v36  ;;  %3715 = vmatprep.mubr.msk.f32.mxu0 %vm4650_vm0, %v6064_v0 }
  0xd0   : > { %3741 = vmatpush3.msra.mxu1 %v4953_v48  ;;  %3716 = vmatmul.mubr.f32.vlgmr.msra.gmra.mxu0 %v4988_v62 }
  0xd1   : > { %3742 = vmatprep.subr.mxu1 %v6064_v0  ;;  %3750 = vmatprep.mubr.msk.f32.mxu1 %vm4650_vm0, %v6064_v0 }
  0xd2   : > { %3743 = vmatpush3.msra.mxu1 %v4982_v59  ;;  %3753 = vmatprep.subr.mxu0 %v6064_v0 }
  0xd3   : > { %3744 = vmatprep.subr.mxu1 %v6064_v0  ;;  %3754 = vmatpush3.msra.mxu0 %v4855_v4 }
  0xd4   : > { %3745 = vmatpush3.msra.mxu1 %v4992_v63  ;;  %3755 = vmatprep.subr.mxu0 %v6064_v0 }
  0xd5   : > { %3746 = vmatprep.subr.mxu1 %v6064_v0  ;;  %3756 = vmatpush3.msra.mxu0 %v4857_v5 }
  0xd6   : > { %3747 = vmatpush3.msra.mxu1 %v5010_v13  ;;  %3757 = vmatprep.subr.mxu0 %v6064_v0 }
  0xd7   : > { %3748 = vmatprep.subr.mxu1 %v6064_v0  ;;  %3758 = vmatpush3.msra.mxu0 %v4859_v6 }
  0xd8   : > { %3749 = vmatpush3.msra.mxu1 %v5028_v32  ;;  %3759 = vmatprep.subr.mxu0 %v6064_v0 }
  0xd9   : > { %3751 = vmatmul.mubr.f32.vlgmr.msra.gmra.mxu1 %v4988_v62  ;;  %3788 = vmatprep.subr.mxu1 %v6064_v0  ;;  %v6115_v62 = vld [vmem:[#allocation22_spill] sm:$0xff] }
  0xda   : > { %3789 = vmatpush3.msra.mxu1 %v4924_v37  ;;  %3760 = vmatpush3.msra.mxu0 %v4861_v10 }
  0xdb   : > { %3790 = vmatprep.subr.mxu1 %v6064_v0  ;;  %3761 = vmatprep.subr.mxu0 %v6064_v0 }
  0xdc   : > { %3791 = vmatpush3.msra.mxu1 %v4926_v38  ;;  %3762 = vmatpush3.msra.mxu0 %v4863_v11 }
  0xdd   : > { %3792 = vmatprep.subr.mxu1 %v6064_v0  ;;  %3763 = vmatprep.subr.mxu0 %v6064_v0 }
  0xde   : > { %3793 = vmatpush3.msra.mxu1 %v4941_v44  ;;  %3764 = vmatpush3.msra.mxu0 %v4865_v12 }
  0xdf   : > { %3794 = vmatprep.subr.mxu1 %v6064_v0  ;;  %3765 = vmatprep.subr.mxu0 %v6064_v0 }
  0xe0   : > { %3795 = vmatpush3.msra.mxu1 %v6115_v62  ;;  %3766 = vmatpush3.msra.mxu0 %v4874_v17 }
  0xe1   : > { %3796 = vmatprep.subr.mxu1 %v6064_v0  ;;  %3767 = vmatprep.subr.mxu0 %v6064_v0 }
  0xe2   : > { %3797 = vmatpush3.msra.mxu1 %v6116_v1  ;;  %3768 = vmatpush3.msra.mxu0 %v4896_v25 }
  0xe3   : > { %3798 = vmatprep.subr.mxu1 %v6064_v0  ;;  %3769 = vmatprep.subr.mxu0 %v6064_v0 }
  0xe4   : > { %3799 = vmatpush3.msra.mxu1 %v6117_v26  ;;  %3770 = vmatpush3.msra.mxu0 %v4902_v28 }
  0xe5   : > { %3800 = vmatprep.subr.mxu1 %v6064_v0  ;;  %3771 = vmatprep.subr.mxu0 %v6064_v0 }
  0xe6   : > { %3801 = vmatpush3.msra.mxu1 %v6118_v42  ;;  %3772 = vmatpush3.msra.mxu0 %v4921_v35  ;;  %v6121_v42 = vld [vmem:[#allocation30_spill] sm:$0xff] }
  0xe7   : > { %3802 = vmatprep.subr.mxu1 %v6064_v0  ;;  %3773 = vmatprep.subr.mxu0 %v6064_v0 }
  0xe8   : > { %3803 = vmatpush3.msra.mxu1 %v6119_v9  ;;  %3774 = vmatpush3.msra.mxu0 %v4943_v45 }
  0xe9   : > { %3804 = vmatprep.subr.mxu1 %v6064_v0  ;;  %3775 = vmatprep.subr.mxu0 %v6064_v0 }
  0xea   : > { %3805 = vmatpush3.msra.mxu1 %v6120_v51  ;;  %3776 = vmatpush3.msra.mxu0 %v4953_v48 }
  0xeb   : > { %3806 = vmatprep.subr.mxu1 %v6064_v0  ;;  %3777 = vmatprep.subr.mxu0 %v6064_v0 }
  0xec   : > { %3807 = vmatpush3.msra.mxu1 %v6121_v42  ;;  %3820 = vmatprep.mubr.msk.f32.mxu1 %vm4650_vm0, %v6064_v0 }
  0xed   : > { %3808 = vmatprep.subr.mxu1 %v6064_v0  ;;  %3778 = vmatpush3.msra.mxu0 %v4982_v59 }
  0xee   : > { %3809 = vmatpush3.msra.mxu1 %v5075_v60  ;;  %3779 = vmatprep.subr.mxu0 %v6064_v0 }
  0xef   : > { %3810 = vmatprep.subr.mxu1 %v6064_v0  ;;  %3780 = vmatpush3.msra.mxu0 %v4992_v63 }
  0xf0   : > { %3811 = vmatpush3.msra.mxu1 %v5089_v49  ;;  %3781 = vmatprep.subr.mxu0 %v6064_v0 }
  0xf1   : > { %3812 = vmatprep.subr.mxu1 %v6064_v0  ;;  %3782 = vmatpush3.msra.mxu0 %v5010_v13 }
  0xf2   : > { %3813 = vmatpush3.msra.mxu1 %v5100_v56  ;;  %3783 = vmatprep.subr.mxu0 %v6064_v0 }
  0xf3   : > { %3814 = vmatprep.subr.mxu1 %v6064_v0  ;;  %3784 = vmatpush3.msra.mxu0 %v5028_v32 }
  0xf4   : > { %3815 = vmatpush3.msra.mxu1 %v5108_v2  ;;  %3785 = vmatprep.mubr.msk.f32.mxu0 %vm4650_vm0, %v6064_v0 }
  0xf5   : > { %3816 = vmatprep.subr.mxu1 %v6064_v0  ;;  %3823 = vmatprep.subr.mxu0 %v6064_v0 }
  0xf6   : > { %3817 = vmatpush3.msra.mxu1 %v5115_v14 }
  0xf7   : > { %3818 = vmatprep.subr.mxu1 %v6064_v0 }
  0xf8   : > { %3819 = vmatpush3.msra.mxu1 %v5121_v33 }
  0xf9   : > { %3858 = vmatprep.subr.mxu1 %v6064_v0 }
 0x14e   : > { %v435_v56 = vpop.f32.mrf.mxu0 }
 0x150   : > { %v3577_v49 = vpop.f32.mrf.mxu0 }
 0x155   : > { %v586_v60 = vpop.f32.mrf.mxu1 }
 0x156   : > { %v587_v62 = vadd.f32 %v586_v60, %v435_v56  ;;  %v6128_v60 = vld [vmem:[#allocation33_spill] sm:$0xff] }
 0x157   : > { %v3612_v42 = vpop.f32.mrf.mxu1 }
 0x16e   : > { %v690_v2 = vpop.f32.mrf.mxu0 }
 0x16f   : > { %v691_v36 = vadd.f32 %v690_v2, %v587_v62  ;;  %v6127_v2 = vld [vmem:[#allocation18_spill] sm:$0xff]  ;;  %v6133_v62 = vld [vmem:[#allocation23_spill] sm:$0xff] }
 0x170   : > { %v3647_v51 = vpop.f32.mrf.mxu0 }
 0x171   : > { %v5513_v51 = vld [vmem:[%s286_s15] sm:$0xff] }
 0x172   : > { %6136 = vst [vmem:[#allocation18_spill] sm:$0xff] %v5513_v51 }
 0x177   : > { %v779_v9 = vpop.f32.mrf.mxu1 }
 0x178   : > { %v780_v38 = vadd.f32 %v779_v9, %v691_v36  ;;  %v6130_v36 = vld [vmem:[#allocation35_spill] sm:$0xff]  ;;  %v6135_v9 = vld [vmem:[#allocation25_spill] sm:$0xff] }
 0x179   : > { %v3682_v26 = vpop.f32.mrf.mxu1 }
 0x190   : > { %v898_v1 = vpop.f32.mrf.mxu0 }
 0x191   : > { %v899_v14 = vadd.f32 %v898_v1, %v780_v38  ;;  %v6124_v38 = vmov 0.0   ;;  %v6134_v1 = vld [vmem:[#allocation24_spill] sm:$0xff] }
 0x192   : > { %v3717_v44 = vpop.f32.mrf.mxu0 }
 0x199   : > { %v985_v7 = vpop.f32.mrf.mxu1 }
 0x19a   : > { %v986_v37 = vadd.f32 %v985_v7, %v899_v14  ;;  %v6129_v7 = vld [vmem:[#allocation19_spill] sm:$0xff]  ;;  %v6131_v14 = vld [vmem:[#allocation20_spill] sm:$0xff] }
 0x19b   : > { %v3752_v52 = vpop.f32.mrf.mxu1 }
 0x19c   : > { %v989_v33 = vmul.f32 0.03125, %v986_v37  ;;  %v6125_v52 = vld [vmem:[#allocation29_spill] sm:$0xff] }
 0x19e   : > { %v5337_v0 = vsub.f32 %v6122_v58, %v989_v33  ;;  %v6126_v58 = vld [vmem:[#allocation31_spill] sm:$0xff]  ;;  %v6132_v33 = vld [vmem:[#allocation22_spill] sm:$0xff] }
 0x1a0   : > { %6123 = vst [vmem:[#allocation21_spill] sm:$0xff] %v5337_v0  ;;  %v991_v49 = vmul.f32 %v5337_v0, %v5337_v0  ;;  %v6141_v0 = vld [vmem:[#allocation34_spill] sm:$0xff] }
 0x1a2   : > { %v5341_v42 = vand.u32 4294901760, %v991_v49 }
 0x1a4   : > { %v5344_v26 = vsub.f32 %v991_v49, %v5341_v42  ;;  %3821 = vmatmul.mubr.f32.vlgmr.msra.gmra.mxu1 %v5341_v42  ;;  %v6137_v49 = vld [vmem:[#allocation26_spill] sm:$0xff] }
 0x1a5   : > { %3859 = vmatpush3.msra.mxu1 %v4855_v4  ;;  %3890 = vmatprep.mubr.msk.f32.mxu1 %vm4650_vm0, %v6124_v38 }
 0x1a6   : > { %3860 = vmatprep.subr.mxu1 %v6124_v38  ;;  %v1075_v37 = vand.u32 4294901760, %v5344_v26 }
 0x1a7   : > { %3861 = vmatpush3.msra.mxu1 %v4857_v5 }
 0x1a8   : > { %3862 = vmatprep.subr.mxu1 %v6124_v38  ;;  %v1076_v44 = vsub.f32 %v5344_v26, %v1075_v37 }
 0x1a9   : > { %3863 = vmatpush3.msra.mxu1 %v4859_v6 }
 0x1aa   : > { %3864 = vmatprep.subr.mxu1 %v6124_v38  ;;  %v1077_v56 = vand.u32 4294901760, %v1076_v44  ;;  %v6140_v44 = vld [vmem:[#allocation32_spill] sm:$0xff] }
 0x1ab   : > { %3865 = vmatpush3.msra.mxu1 %v4861_v10 }
 0x1ac   : > { %3866 = vmatprep.subr.mxu1 %v6124_v38  ;;  %3786 = vmatmul.mubr.f32.vlgmr.msra.gmra.mxu0 %v1077_v56 }
 0x1ad   : > { %3824 = vmatpush3.msra.mxu0 %v4869_v15  ;;  %3867 = vmatpush3.msra.mxu1 %v4863_v11 }
 0x1ae   : > { %3825 = vmatprep.subr.mxu0 %v6124_v38  ;;  %3868 = vmatprep.subr.mxu1 %v6124_v38 }
 0x1af   : > { %3826 = vmatpush3.msra.mxu0 %v4872_v16  ;;  %3869 = vmatpush3.msra.mxu1 %v4865_v12 }
 0x1b0   : > { %3827 = vmatprep.subr.mxu0 %v6124_v38  ;;  %3870 = vmatprep.subr.mxu1 %v6124_v38 }
 0x1b1   : > { %3828 = vmatpush3.msra.mxu0 %v4877_v18  ;;  %3871 = vmatpush3.msra.mxu1 %v4874_v17 }
 0x1b2   : > { %3829 = vmatprep.subr.mxu0 %v6124_v38  ;;  %3872 = vmatprep.subr.mxu1 %v6124_v38 }
 0x1b3   : > { %3830 = vmatpush3.msra.mxu0 %v4881_v20  ;;  %3873 = vmatpush3.msra.mxu1 %v4896_v25 }
 0x1b4   : > { %3831 = vmatprep.subr.mxu0 %v6124_v38  ;;  %3874 = vmatprep.subr.mxu1 %v6124_v38 }
 0x1b5   : > { %3832 = vmatpush3.msra.mxu0 %v4884_v21  ;;  %3875 = vmatpush3.msra.mxu1 %v4902_v28 }
 0x1b6   : > { %3833 = vmatprep.subr.mxu0 %v6124_v38  ;;  %3876 = vmatprep.subr.mxu1 %v6124_v38 }
 0x1b7   : > { %3834 = vmatpush3.msra.mxu0 %v4908_v30  ;;  %3877 = vmatpush3.msra.mxu1 %v4921_v35 }
 0x1b8   : > { %3835 = vmatprep.subr.mxu0 %v6124_v38  ;;  %3878 = vmatprep.subr.mxu1 %v6124_v38 }
 0x1b9   : > { %3836 = vmatpush3.msra.mxu0 %v4918_v34  ;;  %3879 = vmatpush3.msra.mxu1 %v4943_v45 }
 0x1ba   : > { %3837 = vmatprep.subr.mxu0 %v6124_v38  ;;  %3880 = vmatprep.subr.mxu1 %v6124_v38 }
 0x1bb   : > { %3838 = vmatpush3.msra.mxu0 %v4937_v43  ;;  %3881 = vmatpush3.msra.mxu1 %v4953_v48 }
 0x1bc   : > { %3839 = vmatprep.subr.mxu0 %v6124_v38  ;;  %3882 = vmatprep.subr.mxu1 %v6124_v38 }
 0x1bd   : > { %3840 = vmatpush3.msra.mxu0 %v4949_v47  ;;  %3883 = vmatpush3.msra.mxu1 %v4982_v59 }
 0x1be   : > { %3841 = vmatprep.subr.mxu0 %v6124_v38  ;;  %3884 = vmatprep.subr.mxu1 %v6124_v38 }
 0x1bf   : > { %3842 = vmatpush3.msra.mxu0 %v4969_v55  ;;  %3885 = vmatpush3.msra.mxu1 %v4992_v63 }
 0x1c0   : > { %3843 = vmatprep.subr.mxu0 %v6124_v38  ;;  %3886 = vmatprep.subr.mxu1 %v6124_v38 }
 0x1c1   : > { %3844 = vmatpush3.msra.mxu0 %v4985_v61  ;;  %3887 = vmatpush3.msra.mxu1 %v5010_v13 }
 0x1c2   : > { %3845 = vmatprep.subr.mxu0 %v6124_v38  ;;  %3888 = vmatprep.subr.mxu1 %v6124_v38 }
 0x1c3   : > { %3846 = vmatpush3.msra.mxu0 %v5004_v8  ;;  %3889 = vmatpush3.msra.mxu1 %v5028_v32 }
 0x1c4   : > { %3847 = vmatprep.subr.mxu0 %v6124_v38  ;;  %3891 = vmatmul.mubr.f32.vlgmr.msra.gmra.mxu1 %v1075_v37  ;;  %v6139_v37 = vld [vmem:[#allocation30_spill] sm:$0xff] }
 0x1c5   : > { %3928 = vmatprep.subr.mxu1 %v6124_v38  ;;  %3848 = vmatpush3.msra.mxu0 %v5024_v31 }
 0x1c6   : > { %3929 = vmatpush3.msra.mxu1 %v4855_v4  ;;  %3849 = vmatprep.subr.mxu0 %v6124_v38 }
 0x1c7   : > { %3930 = vmatprep.subr.mxu1 %v6124_v38  ;;  %3850 = vmatpush3.msra.mxu0 %v5040_v41 }
 0x1c8   : > { %3931 = vmatpush3.msra.mxu1 %v4857_v5  ;;  %3851 = vmatprep.subr.mxu0 %v6124_v38 }
 0x1c9   : > { %3932 = vmatprep.subr.mxu1 %v6124_v38  ;;  %3852 = vmatpush3.msra.mxu0 %v5055_v54 }
 0x1ca   : > { %3933 = vmatpush3.msra.mxu1 %v4859_v6  ;;  %3853 = vmatprep.subr.mxu0 %v6124_v38 }
 0x1cb   : > { %3934 = vmatprep.subr.mxu1 %v6124_v38  ;;  %3854 = vmatpush3.msra.mxu0 %v5069_v50 }
 0x1cc   : > { %3855 = vmatprep.mubr.msk.f32.mxu0 %vm4650_vm0, %v6124_v38  ;;  %3935 = vmatpush3.msra.mxu1 %v4861_v10 }
 0x1cd   : > { %3856 = vmatmul.mubr.f32.vlgmr.msra.gmra.mxu0 %v5344_v26  ;;  %3893 = vmatprep.subr.mxu0 %v6124_v38  ;;  %v5522_v26 = vand.u32 4294901760, %v5513_v51 }
 0x1ce   : > { %3936 = vmatprep.subr.mxu1 %v6124_v38  ;;  %3894 = vmatpush3.msra.mxu0 %v4888_v22 }
 0x1cf   : > { %3937 = vmatpush3.msra.mxu1 %v4863_v11  ;;  %3895 = vmatprep.subr.mxu0 %v6124_v38  ;;  %v5534_v56 = vsub.f32 %v5513_v51, %v5522_v26  ;;  %v6143_v51 = vld [vmem:[#allocation37_spill] sm:$0xff] }
 0x1d0   : > { %3938 = vmatprep.subr.mxu1 %v6124_v38  ;;  %3896 = vmatpush3.msra.mxu0 %v4891_v23 }
 0x1d1   : > { %3939 = vmatpush3.msra.mxu1 %v4865_v12  ;;  %3897 = vmatprep.subr.mxu0 %v6124_v38 }
 0x1d2   : > { %3940 = vmatprep.subr.mxu1 %v6124_v38  ;;  %3898 = vmatpush3.msra.mxu0 %v4894_v24 }
 0x1d3   : > { %3941 = vmatpush3.msra.mxu1 %v4874_v17  ;;  %3899 = vmatprep.subr.mxu0 %v6124_v38 }
 0x1d4   : > { %3942 = vmatprep.subr.mxu1 %v6124_v38  ;;  %3900 = vmatpush3.msra.mxu0 %v4900_v27 }
 0x1d5   : > { %3943 = vmatpush3.msra.mxu1 %v4896_v25  ;;  %3901 = vmatprep.subr.mxu0 %v6124_v38 }
 0x1d6   : > { %3944 = vmatprep.subr.mxu1 %v6124_v38  ;;  %3902 = vmatpush3.msra.mxu0 %v4905_v29 }
 0x1d7   : > { %3945 = vmatpush3.msra.mxu1 %v4902_v28  ;;  %3903 = vmatprep.subr.mxu0 %v6124_v38 }
 0x1d8   : > { %3946 = vmatprep.subr.mxu1 %v6124_v38  ;;  %3904 = vmatpush3.msra.mxu0 %v4931_v40 }
 0x1d9   : > { %3947 = vmatpush3.msra.mxu1 %v4921_v35  ;;  %3905 = vmatprep.subr.mxu0 %v6124_v38 }
 0x1da   : > { %3948 = vmatprep.subr.mxu1 %v6124_v38  ;;  %3906 = vmatpush3.msra.mxu0 %v4946_v46 }
 0x1db   : > { %3949 = vmatpush3.msra.mxu1 %v4943_v45  ;;  %3907 = vmatprep.subr.mxu0 %v6124_v38 }
 0x1dc   : > { %3950 = vmatprep.subr.mxu1 %v6124_v38  ;;  %3908 = vmatpush3.msra.mxu0 %v4966_v53 }
 0x1dd   : > { %3951 = vmatpush3.msra.mxu1 %v4953_v48  ;;  %3909 = vmatprep.subr.mxu0 %v6124_v38 }
 0x1de   : > { %3952 = vmatprep.subr.mxu1 %v6124_v38  ;;  %3910 = vmatpush3.msra.mxu0 %v4976_v57 }
 0x1df   : > { %3953 = vmatpush3.msra.mxu1 %v4982_v59  ;;  %3911 = vmatprep.subr.mxu0 %v6124_v38 }
 0x1e0   : > { %3954 = vmatprep.subr.mxu1 %v6124_v38  ;;  %3912 = vmatpush3.msra.mxu0 %v5001_v3 }
 0x1e1   : > { %3955 = vmatpush3.msra.mxu1 %v4992_v63  ;;  %3913 = vmatprep.subr.mxu0 %v6124_v38 }
 0x1e2   : > { %3956 = vmatprep.subr.mxu1 %v6124_v38  ;;  %3914 = vmatpush3.msra.mxu0 %v5017_v19 }
 0x1e3   : > { %3957 = vmatpush3.msra.mxu1 %v5010_v13  ;;  %3915 = vmatprep.subr.mxu0 %v6124_v38 }
 0x1e4   : > { %3958 = vmatprep.subr.mxu1 %v6124_v38  ;;  %3916 = vmatpush3.msra.mxu0 %v5037_v39 }
 0x1e5   : > { %3959 = vmatpush3.msra.mxu1 %v5028_v32  ;;  %3960 = vmatprep.mubr.msk.f32.mxu1 %vm4650_vm0, %v6124_v38 }
 0x1e6   : > { %3917 = vmatprep.subr.mxu0 %v6124_v38  ;;  %3961 = vmatmul.mubr.f32.vlgmr.msra.gmra.mxu1 %v5341_v42 }
 0x1e7   : > { %3918 = vmatpush3.msra.mxu0 %v6125_v52  ;;  %3925 = vmatprep.mubr.msk.f32.mxu0 %vm4650_vm0, %v6124_v38 }
 0x1e8   : > { %3919 = vmatprep.subr.mxu0 %v6124_v38  ;;  %3998 = vmatprep.subr.mxu1 %v6124_v38 }
 0x1e9   : > { %3920 = vmatpush3.msra.mxu0 %v6126_v58  ;;  %3999 = vmatpush3.msra.mxu1 %v6127_v2 }
 0x1ea   : > { %3921 = vmatprep.subr.mxu0 %v6124_v38  ;;  %4000 = vmatprep.subr.mxu1 %v6124_v38 }
 0x1eb   : > { %3922 = vmatpush3.msra.mxu0 %v6128_v60  ;;  %4001 = vmatpush3.msra.mxu1 %v6129_v7 }
 0x1ec   : > { %3923 = vmatprep.subr.mxu0 %v6124_v38  ;;  %4002 = vmatprep.subr.mxu1 %v6124_v38 }
 0x1ed   : > { %3924 = vmatpush3.msra.mxu0 %v6130_v36  ;;  %4003 = vmatpush3.msra.mxu1 %v6131_v14 }
 0x1ee   : > { %3926 = vmatmul.mubr.f32.vlgmr.msra.gmra.mxu0 %v5341_v42  ;;  %3963 = vmatprep.subr.mxu0 %v6124_v38  ;;  %v6138_v42 = vld [vmem:[#allocation28_spill] sm:$0xff] }
 0x1ef   : > { %3964 = vmatpush3.msra.mxu0 %v4855_v4  ;;  %4004 = vmatprep.subr.mxu1 %v6124_v38 }
 0x1f0   : > { %3965 = vmatprep.subr.mxu0 %v6124_v38  ;;  %4005 = vmatpush3.msra.mxu1 %v6132_v33 }
 0x1f1   : > { %3966 = vmatpush3.msra.mxu0 %v4857_v5  ;;  %4006 = vmatprep.subr.mxu1 %v6124_v38 }
 0x1f2   : > { %3967 = vmatprep.subr.mxu0 %v6124_v38  ;;  %4007 = vmatpush3.msra.mxu1 %v6133_v62 }
 0x1f3   : > { %3968 = vmatpush3.msra.mxu0 %v4859_v6  ;;  %4008 = vmatprep.subr.mxu1 %v6124_v38 }
 0x1f4   : > { %3969 = vmatprep.subr.mxu0 %v6124_v38  ;;  %4009 = vmatpush3.msra.mxu1 %v6134_v1 }
 0x1f5   : > { %3970 = vmatpush3.msra.mxu0 %v4861_v10  ;;  %4010 = vmatprep.subr.mxu1 %v6124_v38 }
 0x1f6   : > { %3971 = vmatprep.subr.mxu0 %v6124_v38  ;;  %4011 = vmatpush3.msra.mxu1 %v6135_v9 }
 0x1f7   : > { %3972 = vmatpush3.msra.mxu0 %v4863_v11  ;;  %4012 = vmatprep.subr.mxu1 %v6124_v38 }
 0x1f8   : > { %3973 = vmatprep.subr.mxu0 %v6124_v38  ;;  %4013 = vmatpush3.msra.mxu1 %v6137_v49 }
 0x1f9   : > { %3974 = vmatpush3.msra.mxu0 %v4865_v12  ;;  %4014 = vmatprep.subr.mxu1 %v6124_v38 }
 0x1fa   : > { %3975 = vmatprep.subr.mxu0 %v6124_v38  ;;  %4015 = vmatpush3.msra.mxu1 %v6138_v42 }
 0x1fb   : > { %3976 = vmatpush3.msra.mxu0 %v4874_v17  ;;  %4016 = vmatprep.subr.mxu1 %v6124_v38 }
 0x1fc   : > { %3977 = vmatprep.subr.mxu0 %v6124_v38  ;;  %4017 = vmatpush3.msra.mxu1 %v6139_v37  ;;  %v6142_v37 = vld [vmem:[#allocation36_spill] sm:$0xff] }
 0x1fd   : > { %3978 = vmatpush3.msra.mxu0 %v4896_v25  ;;  %4018 = vmatprep.subr.mxu1 %v6124_v38 }
 0x1fe   : > { %3979 = vmatprep.subr.mxu0 %v6124_v38  ;;  %4019 = vmatpush3.msra.mxu1 %v6140_v44  ;;  %v1732_v44 = vand.u32 4294901760, %v5534_v56 }
 0x1ff   : > { %3980 = vmatpush3.msra.mxu0 %v4902_v28  ;;  %4020 = vmatprep.subr.mxu1 %v6124_v38 }
 0x200   : > { %3981 = vmatprep.subr.mxu0 %v6124_v38  ;;  %4021 = vmatpush3.msra.mxu1 %v6141_v0  ;;  %v6144_v0 = vld [vmem:[#allocation38_spill] sm:$0xff] }
 0x201   : > { %3982 = vmatpush3.msra.mxu0 %v4921_v35  ;;  %4022 = vmatprep.subr.mxu1 %v6124_v38 }
 0x202   : > { %3983 = vmatprep.subr.mxu0 %v6124_v38  ;;  %4023 = vmatpush3.msra.mxu1 %v6142_v37  ;;  %v1733_v37 = vsub.f32 %v5534_v56, %v1732_v44 }
 0x203   : > { %3984 = vmatpush3.msra.mxu0 %v4943_v45  ;;  %4024 = vmatprep.subr.mxu1 %v6124_v38 }
 0x204   : > { %3985 = vmatprep.subr.mxu0 %v6124_v38  ;;  %4025 = vmatpush3.msra.mxu1 %v6143_v51  ;;  %v6145_v51 = vld [vmem:[#allocation39_spill] sm:$0xff] }
 0x205   : > { %3986 = vmatpush3.msra.mxu0 %v4953_v48  ;;  %4026 = vmatprep.subr.mxu1 %v6124_v38 }
 0x206   : > { %3987 = vmatprep.subr.mxu0 %v6124_v38  ;;  %4027 = vmatpush3.msra.mxu1 %v6144_v0  ;;  %v1734_v0 = vand.u32 4294901760, %v1733_v37 }
 0x207   : > { %3988 = vmatpush3.msra.mxu0 %v4982_v59  ;;  %4028 = vmatprep.subr.mxu1 %v6124_v38 }
 0x208   : > { %3989 = vmatprep.subr.mxu0 %v6124_v38  ;;  %3995 = vmatprep.mubr.msk.f32.mxu0 %vm4650_vm0, %v6124_v38 }
 0x209   : > { %3990 = vmatpush3.msra.mxu0 %v4992_v63  ;;  %4029 = vmatpush3.msra.mxu1 %v6145_v51 }
 0x20a   : > { %3991 = vmatprep.subr.mxu0 %v6124_v38  ;;  %4030 = vmatprep.mubr.msk.f32.mxu1 %vm4650_vm0, %v6124_v38 }
 0x20b   : > { %3992 = vmatpush3.msra.mxu0 %v5010_v13  ;;  %4068 = vmatprep.subr.mxu1 %v6124_v38 }
 0x20c   : > { %3993 = vmatprep.subr.mxu0 %v6124_v38  ;;  %4031 = vmatmul.mubr.f32.vlgmr.msra.gmra.mxu1 %v5522_v26 }
 0x20d   : > { %3994 = vmatpush3.msra.mxu0 %v5028_v32  ;;  %4069 = vmatpush3.msra.mxu1 %v4855_v4 }
 0x20e   : > { %3996 = vmatmul.mubr.f32.vlgmr.msra.gmra.mxu0 %v1734_v0  ;;  %4033 = vmatprep.subr.mxu0 %v6124_v38 }
 0x20f   : > { %4034 = vmatpush3.msra.mxu0 %v4869_v15  ;;  %4070 = vmatprep.subr.mxu1 %v6124_v38 }
 0x210   : > { %4035 = vmatprep.subr.mxu0 %v6124_v38  ;;  %4071 = vmatpush3.msra.mxu1 %v4857_v5 }
 0x211   : > { %4036 = vmatpush3.msra.mxu0 %v4872_v16  ;;  %4072 = vmatprep.subr.mxu1 %v6124_v38 }
 0x212   : > { %4037 = vmatprep.subr.mxu0 %v6124_v38  ;;  %4073 = vmatpush3.msra.mxu1 %v4859_v6 }
 0x213   : > { %4038 = vmatpush3.msra.mxu0 %v4877_v18  ;;  %4074 = vmatprep.subr.mxu1 %v6124_v38 }
 0x214   : > { %4039 = vmatprep.subr.mxu0 %v6124_v38  ;;  %4075 = vmatpush3.msra.mxu1 %v4861_v10 }
 0x215   : > { %4040 = vmatpush3.msra.mxu0 %v4881_v20  ;;  %4076 = vmatprep.subr.mxu1 %v6124_v38 }
 0x216   : > { %4041 = vmatprep.subr.mxu0 %v6124_v38  ;;  %4077 = vmatpush3.msra.mxu1 %v4863_v11 }
 0x217   : > { %4042 = vmatpush3.msra.mxu0 %v4884_v21  ;;  %4078 = vmatprep.subr.mxu1 %v6124_v38 }
 0x218   : > { %4043 = vmatprep.subr.mxu0 %v6124_v38  ;;  %4079 = vmatpush3.msra.mxu1 %v4865_v12 }
 0x219   : > { %4044 = vmatpush3.msra.mxu0 %v4908_v30  ;;  %4080 = vmatprep.subr.mxu1 %v6124_v38 }
 0x21a   : > { %4045 = vmatprep.subr.mxu0 %v6124_v38  ;;  %4081 = vmatpush3.msra.mxu1 %v4874_v17 }
 0x21b   : > { %4046 = vmatpush3.msra.mxu0 %v4918_v34  ;;  %4082 = vmatprep.subr.mxu1 %v6124_v38 }
 0x21c   : > { %4047 = vmatprep.subr.mxu0 %v6124_v38  ;;  %4083 = vmatpush3.msra.mxu1 %v4896_v25 }
 0x21d   : > { %4048 = vmatpush3.msra.mxu0 %v4937_v43  ;;  %4084 = vmatprep.subr.mxu1 %v6124_v38 }
 0x21e   : > { %4049 = vmatprep.subr.mxu0 %v6124_v38  ;;  %4085 = vmatpush3.msra.mxu1 %v4902_v28 }
 0x21f   : > { %4050 = vmatpush3.msra.mxu0 %v4949_v47  ;;  %4086 = vmatprep.subr.mxu1 %v6124_v38 }
 0x220   : > { %4051 = vmatprep.subr.mxu0 %v6124_v38  ;;  %4087 = vmatpush3.msra.mxu1 %v4921_v35 }
 0x221   : > { %4052 = vmatpush3.msra.mxu0 %v4969_v55  ;;  %4088 = vmatprep.subr.mxu1 %v6124_v38 }
 0x222   : > { %4053 = vmatprep.subr.mxu0 %v6124_v38  ;;  %4089 = vmatpush3.msra.mxu1 %v4943_v45 }
 0x223   : > { %4054 = vmatpush3.msra.mxu0 %v4985_v61  ;;  %4090 = vmatprep.subr.mxu1 %v6124_v38 }
 0x224   : > { %4055 = vmatprep.subr.mxu0 %v6124_v38  ;;  %4091 = vmatpush3.msra.mxu1 %v4953_v48 }
 0x225   : > { %4056 = vmatpush3.msra.mxu0 %v5004_v8  ;;  %4092 = vmatprep.subr.mxu1 %v6124_v38 }
 0x226   : > { %4057 = vmatprep.subr.mxu0 %v6124_v38  ;;  %4093 = vmatpush3.msra.mxu1 %v4982_v59 }
 0x227   : > { %4058 = vmatpush3.msra.mxu0 %v5024_v31  ;;  %4094 = vmatprep.subr.mxu1 %v6124_v38 }
 0x228   : > { %4059 = vmatprep.subr.mxu0 %v6124_v38  ;;  %4095 = vmatpush3.msra.mxu1 %v4992_v63 }
 0x229   : > { %4060 = vmatpush3.msra.mxu0 %v5040_v41  ;;  %4096 = vmatprep.subr.mxu1 %v6124_v38 }
 0x22a   : > { %4061 = vmatprep.subr.mxu0 %v6124_v38  ;;  %4097 = vmatpush3.msra.mxu1 %v5010_v13 }
 0x22b   : > { %4062 = vmatpush3.msra.mxu0 %v5055_v54  ;;  %4098 = vmatprep.subr.mxu1 %v6124_v38 }
 0x22c   : > { %4063 = vmatprep.subr.mxu0 %v6124_v38  ;;  %4065 = vmatprep.mubr.msk.f32.mxu0 %vm4650_vm0, %v6124_v38 }
 0x22d   : > { %4064 = vmatpush3.msra.mxu0 %v5069_v50  ;;  %4099 = vmatpush3.msra.mxu1 %v5028_v32 }
 0x22e   : > { %4066 = vmatmul.mubr.f32.vlgmr.msra.gmra.mxu0 %v5534_v56  ;;  %4100 = vmatprep.mubr.msk.f32.mxu1 %vm4650_vm0, %v6124_v38 }
 0x22f   : > { %4103 = vmatprep.subr.mxu0 %v6124_v38  ;;  %4138 = vmatprep.subr.mxu1 %v6124_v38 }
 0x230   : > { %4101 = vmatmul.mubr.f32.vlgmr.msra.gmra.mxu1 %v1732_v44  ;;  %4104 = vmatpush3.msra.mxu0 %v4888_v22 }
 0x231   : > { %4139 = vmatpush3.msra.mxu1 %v4855_v4  ;;  %4105 = vmatprep.subr.mxu0 %v6124_v38 }
 0x232   : > { %4140 = vmatprep.subr.mxu1 %v6124_v38  ;;  %4106 = vmatpush3.msra.mxu0 %v4891_v23 }
 0x233   : > { %4141 = vmatpush3.msra.mxu1 %v4857_v5  ;;  %4107 = vmatprep.subr.mxu0 %v6124_v38 }
 0x234   : > { %4142 = vmatprep.subr.mxu1 %v6124_v38  ;;  %4108 = vmatpush3.msra.mxu0 %v4894_v24 }
 0x235   : > { %4143 = vmatpush3.msra.mxu1 %v4859_v6  ;;  %4109 = vmatprep.subr.mxu0 %v6124_v38 }
 0x236   : > { %4144 = vmatprep.subr.mxu1 %v6124_v38  ;;  %4110 = vmatpush3.msra.mxu0 %v4900_v27 }
 0x237   : > { %4145 = vmatpush3.msra.mxu1 %v4861_v10  ;;  %4111 = vmatprep.subr.mxu0 %v6124_v38 }
 0x238   : > { %4146 = vmatprep.subr.mxu1 %v6124_v38  ;;  %4112 = vmatpush3.msra.mxu0 %v4905_v29 }
 0x239   : > { %4147 = vmatpush3.msra.mxu1 %v4863_v11  ;;  %4113 = vmatprep.subr.mxu0 %v6124_v38 }
 0x23a   : > { %4148 = vmatprep.subr.mxu1 %v6124_v38  ;;  %4114 = vmatpush3.msra.mxu0 %v4931_v40 }
 0x23b   : > { %4149 = vmatpush3.msra.mxu1 %v4865_v12  ;;  %4115 = vmatprep.subr.mxu0 %v6124_v38 }
 0x23c   : > { %4150 = vmatprep.subr.mxu1 %v6124_v38  ;;  %4116 = vmatpush3.msra.mxu0 %v4946_v46 }
 0x23d   : > { %4151 = vmatpush3.msra.mxu1 %v4874_v17  ;;  %4117 = vmatprep.subr.mxu0 %v6124_v38 }
 0x23e   : > { %4152 = vmatprep.subr.mxu1 %v6124_v38  ;;  %4118 = vmatpush3.msra.mxu0 %v4966_v53 }
 0x23f   : > { %4153 = vmatpush3.msra.mxu1 %v4896_v25  ;;  %4119 = vmatprep.subr.mxu0 %v6124_v38 }
 0x240   : > { %4154 = vmatprep.subr.mxu1 %v6124_v38  ;;  %4120 = vmatpush3.msra.mxu0 %v4976_v57 }
 0x241   : > { %4155 = vmatpush3.msra.mxu1 %v4902_v28  ;;  %4121 = vmatprep.subr.mxu0 %v6124_v38 }
 0x242   : > { %4156 = vmatprep.subr.mxu1 %v6124_v38  ;;  %4122 = vmatpush3.msra.mxu0 %v5001_v3 }
 0x243   : > { %4157 = vmatpush3.msra.mxu1 %v4921_v35  ;;  %4123 = vmatprep.subr.mxu0 %v6124_v38 }
 0x244   : > { %4158 = vmatprep.subr.mxu1 %v6124_v38  ;;  %4124 = vmatpush3.msra.mxu0 %v5017_v19 }
 0x245   : > { %4159 = vmatpush3.msra.mxu1 %v4943_v45  ;;  %4125 = vmatprep.subr.mxu0 %v6124_v38 }
 0x246   : > { %4160 = vmatprep.subr.mxu1 %v6124_v38  ;;  %4126 = vmatpush3.msra.mxu0 %v5037_v39 }
 0x247   : > { %4161 = vmatpush3.msra.mxu1 %v4953_v48  ;;  %4127 = vmatprep.subr.mxu0 %v6124_v38 }
 0x248   : > { %4162 = vmatprep.subr.mxu1 %v6124_v38  ;;  %4128 = vmatpush3.msra.mxu0 %v6125_v52 }
 0x249   : > { %4163 = vmatpush3.msra.mxu1 %v4982_v59  ;;  %4129 = vmatprep.subr.mxu0 %v6124_v38 }
 0x24a   : > { %4164 = vmatprep.subr.mxu1 %v6124_v38  ;;  %4130 = vmatpush3.msra.mxu0 %v6126_v58  ;;  %v1636_v58 = vlaneseq }
 0x24b   : > { %4165 = vmatpush3.msra.mxu1 %v4992_v63  ;;  %4131 = vmatprep.subr.mxu0 %v6124_v38 }
 0x24c   : > { %4166 = vmatprep.subr.mxu1 %v6124_v38  ;;  %4132 = vmatpush3.msra.mxu0 %v6128_v60  ;;  %v5781_v52 = vshrl.u32 %v1636_v58, 7  ;;  %v6155_v58 = vld [vmem:[#allocation21_spill] sm:$0xff] }
 0x24d   : > { %4167 = vmatpush3.msra.mxu1 %v5010_v13  ;;  %4133 = vmatprep.subr.mxu0 %v6124_v38 }
 0x24e   : > { %4168 = vmatprep.subr.mxu1 %v6124_v38  ;;  %4134 = vmatpush3.msra.mxu0 %v6130_v36  ;;  %6152 = vst [vmem:[#allocation19_spill] sm:$0xff] %v5781_v52 }
 0x24f   : > { %4135 = vmatprep.mubr.msk.f32.mxu0 %vm4650_vm0, %v6124_v38  ;;  %4169 = vmatpush3.msra.mxu1 %v5028_v32 }
 0x250   : > { %4170 = vmatprep.mubr.msk.f32.mxu1 %vm4650_vm0, %v6124_v38  ;;  %4136 = vmatmul.mubr.f32.vlgmr.msra.gmra.mxu0 %v5522_v26 }
 0x251   : > { %4171 = vmatmul.mubr.f32.vlgmr.msra.gmra.mxu1 %v5522_v26  ;;  %4208 = vmatprep.subr.mxu1 %v6124_v38 }
 0x252   : > { %4209 = vmatpush3.msra.mxu1 %v6127_v2  ;;  %4173 = vmatprep.subr.mxu0 %v6124_v38  ;;  %v6146_v2 = vld [vmem:[#allocation30_spill] sm:$0xff] }
 0x253   : > { %4210 = vmatprep.subr.mxu1 %v6124_v38  ;;  %4174 = vmatpush3.msra.mxu0 %v4855_v4 }
 0x254   : > { %4211 = vmatpush3.msra.mxu1 %v6129_v7  ;;  %4175 = vmatprep.subr.mxu0 %v6124_v38 }
 0x255   : > { %4212 = vmatprep.subr.mxu1 %v6124_v38  ;;  %4176 = vmatpush3.msra.mxu0 %v4857_v5 }
 0x256   : > { %4213 = vmatpush3.msra.mxu1 %v6131_v14  ;;  %4177 = vmatprep.subr.mxu0 %v6124_v38  ;;  %v6147_v14 = vld [vmem:[#allocation32_spill] sm:$0xff] }
 0x257   : > { %4214 = vmatprep.subr.mxu1 %v6124_v38  ;;  %4178 = vmatpush3.msra.mxu0 %v4859_v6 }
 0x258   : > { %4215 = vmatpush3.msra.mxu1 %v6132_v33  ;;  %4179 = vmatprep.subr.mxu0 %v6124_v38  ;;  %v6148_v33 = vld [vmem:[#allocation34_spill] sm:$0xff] }
 0x259   : > { %4216 = vmatprep.subr.mxu1 %v6124_v38  ;;  %4180 = vmatpush3.msra.mxu0 %v4861_v10 }
 0x25a   : > { %4217 = vmatpush3.msra.mxu1 %v6133_v62  ;;  %4181 = vmatprep.subr.mxu0 %v6124_v38  ;;  %v6149_v62 = vld [vmem:[#allocation36_spill] sm:$0xff] }
 0x25b   : > { %4218 = vmatprep.subr.mxu1 %v6124_v38  ;;  %4182 = vmatpush3.msra.mxu0 %v4863_v11 }
 0x25c   : > { %4219 = vmatpush3.msra.mxu1 %v6134_v1  ;;  %4183 = vmatprep.subr.mxu0 %v6124_v38 }
 0x25d   : > { %4220 = vmatprep.subr.mxu1 %v6124_v38  ;;  %4184 = vmatpush3.msra.mxu0 %v4865_v12 }
 0x25e   : > { %4221 = vmatpush3.msra.mxu1 %v6135_v9  ;;  %4185 = vmatprep.subr.mxu0 %v6124_v38  ;;  %v6150_v9 = vld [vmem:[#allocation37_spill] sm:$0xff] }
 0x25f   : > { %4222 = vmatprep.subr.mxu1 %v6124_v38  ;;  %4186 = vmatpush3.msra.mxu0 %v4874_v17 }
 0x260   : > { %4223 = vmatpush3.msra.mxu1 %v6137_v49  ;;  %4187 = vmatprep.subr.mxu0 %v6124_v38 }
 0x261   : > { %4224 = vmatprep.subr.mxu1 %v6124_v38  ;;  %4188 = vmatpush3.msra.mxu0 %v4896_v25 }
 0x262   : > { %4225 = vmatpush3.msra.mxu1 %v6138_v42  ;;  %4189 = vmatprep.subr.mxu0 %v6124_v38  ;;  %v6151_v42 = vld [vmem:[#allocation38_spill] sm:$0xff] }
 0x263   : > { %4226 = vmatprep.subr.mxu1 %v6124_v38  ;;  %4190 = vmatpush3.msra.mxu0 %v4902_v28 }
 0x264   : > { %v1230_v0 = vpop.f32.mrf.mxu1  ;;  %4227 = vmatpush3.msra.mxu1 %v6146_v2  ;;  %4191 = vmatprep.subr.mxu0 %v6124_v38 }
 0x265   : > { %4228 = vmatprep.subr.mxu1 %v6124_v38  ;;  %4192 = vmatpush3.msra.mxu0 %v4921_v35 }
 0x266   : > { %v3822_v7 = vpop.f32.mrf.mxu1  ;;  %4229 = vmatpush3.msra.mxu1 %v6147_v14  ;;  %4193 = vmatprep.subr.mxu0 %v6124_v38 }
 0x267   : > { %4230 = vmatprep.subr.mxu1 %v6124_v38  ;;  %4194 = vmatpush3.msra.mxu0 %v4943_v45 }
 0x268   : > { %4231 = vmatpush3.msra.mxu1 %v6148_v33  ;;  %4195 = vmatprep.subr.mxu0 %v6124_v38 }
 0x269   : > { %4232 = vmatprep.subr.mxu1 %v6124_v38  ;;  %4196 = vmatpush3.msra.mxu0 %v4953_v48 }
 0x26a   : > { %4233 = vmatpush3.msra.mxu1 %v6149_v62  ;;  %4197 = vmatprep.subr.mxu0 %v6124_v38 }
 0x26b   : > { %4234 = vmatprep.subr.mxu1 %v6124_v38  ;;  %4240 = vmatprep.mubr.msk.f32.mxu1 %vm4650_vm0, %v6124_v38 }
 0x26c   : > { %v1079_v1 = vpop.f32.mrf.mxu0  ;;  %4235 = vmatpush3.msra.mxu1 %v6150_v9  ;;  %4198 = vmatpush3.msra.mxu0 %v4982_v59 }
 0x26d   : > { %4236 = vmatprep.subr.mxu1 %v6124_v38  ;;  %4199 = vmatprep.subr.mxu0 %v6124_v38  ;;  %v1231_v7 = vadd.f32 %v1230_v0, %v1079_v1  ;;  %v5787_v0 = vld [vmem:[%s6013_s2] sm:$0x3] }
 0x26e   : > { %v3787_v49 = vpop.f32.mrf.mxu0  ;;  %4237 = vmatpush3.msra.mxu1 %v6151_v42  ;;  %4200 = vmatpush3.msra.mxu0 %v4992_v63  ;;  %6153 = vst [vmem:[#allocation20_spill] sm:$0xff] %v5787_v0 }
 0x26f   : > { %4238 = vmatprep.subr.mxu1 %v6124_v38  ;;  %4201 = vmatprep.subr.mxu0 %v6124_v38 }
 0x270   : > { %4239 = vmatpush3.msra.mxu1 %v6145_v51  ;;  %4202 = vmatpush3.msra.mxu0 %v5010_v13 }
 0x271   : > { %4278 = vmatprep.subr.mxu1 %v6124_v38  ;;  %4203 = vmatprep.subr.mxu0 %v6124_v38 }
 0x272   : > { %4204 = vmatpush3.msra.mxu0 %v5028_v32  ;;  %4205 = vmatprep.mubr.msk.f32.mxu0 %vm4650_vm0, %v6124_v38 }
 0x273   : > { %4243 = vmatprep.subr.mxu0 %v6124_v38 }
 0x284   : > { %v1423_v26 = vpop.f32.mrf.mxu1 }
 0x286   : > { %v3892_v37 = vpop.f32.mrf.mxu1 }
 0x287   : > { %v1638_v37 = vsub.s32 0, %v5781_v52 }
 0x289   : > { %v1639_v1 = vrot.slane %v5787_v0, %v1638_v37 }
 0x28d   : > { %v1334_v44 = vpop.f32.mrf.mxu0 }
 0x28e   : > { %v1335_v14 = vadd.f32 %v1334_v44, %v1231_v7 }
 0x28f   : > { %v3857_v56 = vpop.f32.mrf.mxu0 }
 0x290   : > { %v1424_v33 = vadd.f32 %v1423_v26, %v1335_v14  ;;  %v5793_v26 = vld [vmem:[%s6014_s3] sm:$0x3] }
 0x291   : > { %6154 = vst [vmem:[#allocation22_spill] sm:$0xff] %v5793_v26 }
 0x2a6   : > { %v1629_v2 = vpop.f32.mrf.mxu1 }
 0x2a8   : > { %v3962_v51 = vpop.f32.mrf.mxu1 }
 0x2ae   : > { %v1542_v62 = vpop.f32.mrf.mxu0 }
 0x2af   : > { %v1543_v9 = vadd.f32 %v1542_v62, %v1424_v33 }
 0x2b0   : > { %v3927_v49 = vpop.f32.mrf.mxu0 }
 0x2b1   : > { %v1630_v42 = vadd.f32 %v1629_v2, %v1543_v9 }
 0x2b3   : > { %v1633_v36 = vmul.f32 0.03125, %v1630_v42 }
 0x2b5   : > { %v1634_v60 = vadd.f32 1e-06, %v1633_v36 }
 0x2b7   : > { %4454 = vrsqrt.f32 %v1634_v60  ;;  %v1645_v60 = vrot.slane %v5793_v26, %v1638_v37 }
 0x2c4   : > { %v4455_v44 = vpop.eup %4454 }
 0x2c5   : > { %v1640_v36 = vmul.f32 %v4455_v44, %v1639_v1 }
 0x2c7   : > { %v1641_v56 = vmul.f32 %v1640_v36, %v6155_v58 }
 0x2c9   : > { %v1646_v2 = vadd.f32 %v1645_v60, %v1641_v56  ;;  %v6156_v56 = vld [vmem:[#allocation18_spill] sm:$0xff] }
 0x2cb   : > { %1647 = vst [vmem:[%s321_s20] sm:$0xff] %v1646_v2 }
 0x2cc   : > { %v1887_v7 = vpop.f32.mrf.mxu1 }
 0x2ce   : > { %v1736_v51 = vpop.f32.mrf.mxu0  ;;  %v4032_v14 = vpop.f32.mrf.mxu1 }
 0x2cf   : > { %v1888_v0 = vadd.f32 %v1887_v7, %v1736_v51 }
 0x2d0   : > { %v3997_v33 = vpop.f32.mrf.mxu0 }
 0x2ee   : > { %v1991_v62 = vpop.f32.mrf.mxu0 }
 0x2ef   : > { %v1992_v52 = vadd.f32 %v1991_v62, %v1888_v0 }
 0x2f0   : > { %v2080_v9 = vpop.f32.mrf.mxu1  ;;  %v4067_v49 = vpop.f32.mrf.mxu0 }
 0x2f1   : > { %v2081_v39 = vadd.f32 %v2080_v9, %v1992_v52 }
 0x2f2   : > { %v4102_v42 = vpop.f32.mrf.mxu1 }
 0x310   : > { %v2199_v1 = vpop.f32.mrf.mxu0 }
 0x311   : > { %v2200_v44 = vadd.f32 %v2199_v1, %v2081_v39  ;;  %v2286_v37 = vpop.f32.mrf.mxu1 }
 0x312   : > { %v4137_v26 = vpop.f32.mrf.mxu0 }
 0x313   : > { %v2287_v36 = vadd.f32 %v2286_v37, %v2200_v44  ;;  %v4172_v60 = vpop.f32.mrf.mxu1 }
 0x315   : > { %v2290_v58 = vmul.f32 0.03125, %v2287_v36 }
 0x317   : > { %v5801_v2 = vsub.f32 %v6156_v56, %v2290_v58 }
 0x319   : > { %v2292_v14 = vmul.f32 %v5801_v2, %v5801_v2 }
 0x31b   : > { %v5805_v33 = vand.u32 4294901760, %v2292_v14 }
 0x31d   : > { %v5808_v49 = vsub.f32 %v2292_v14, %v5805_v33  ;;  %4241 = vmatmul.mubr.f32.vlgmr.msra.gmra.mxu1 %v5805_v33 }
 0x31e   : > { %4279 = vmatpush3.msra.mxu1 %v4855_v4  ;;  %4310 = vmatprep.mubr.msk.f32.mxu1 %vm4650_vm0, %v6124_v38 }
 0x31f   : > { %4280 = vmatprep.subr.mxu1 %v6124_v38  ;;  %v2376_v39 = vand.u32 4294901760, %v5808_v49 }
 0x320   : > { %4281 = vmatpush3.msra.mxu1 %v4857_v5 }
 0x321   : > { %4282 = vmatprep.subr.mxu1 %v6124_v38  ;;  %v2377_v52 = vsub.f32 %v5808_v49, %v2376_v39 }
 0x322   : > { %4283 = vmatpush3.msra.mxu1 %v4859_v6 }
 0x323   : > { %4284 = vmatprep.subr.mxu1 %v6124_v38  ;;  %v2378_v0 = vand.u32 4294901760, %v2377_v52 }
 0x324   : > { %4285 = vmatpush3.msra.mxu1 %v4861_v10 }
 0x325   : > { %4286 = vmatprep.subr.mxu1 %v6124_v38  ;;  %4206 = vmatmul.mubr.f32.vlgmr.msra.gmra.mxu0 %v2378_v0 }
 0x326   : > { %4244 = vmatpush3.msra.mxu0 %v4869_v15  ;;  %4287 = vmatpush3.msra.mxu1 %v4863_v11 }
 0x327   : > { %4245 = vmatprep.subr.mxu0 %v6124_v38  ;;  %4288 = vmatprep.subr.mxu1 %v6124_v38 }
 0x328   : > { %4246 = vmatpush3.msra.mxu0 %v4872_v16  ;;  %4289 = vmatpush3.msra.mxu1 %v4865_v12 }
 0x329   : > { %4247 = vmatprep.subr.mxu0 %v6124_v38  ;;  %4290 = vmatprep.subr.mxu1 %v6124_v38 }
 0x32a   : > { %4248 = vmatpush3.msra.mxu0 %v4877_v18  ;;  %4291 = vmatpush3.msra.mxu1 %v4874_v17 }
 0x32b   : > { %4249 = vmatprep.subr.mxu0 %v6124_v38  ;;  %4292 = vmatprep.subr.mxu1 %v6124_v38 }
 0x32c   : > { %4250 = vmatpush3.msra.mxu0 %v4881_v20  ;;  %4293 = vmatpush3.msra.mxu1 %v4896_v25 }
 0x32d   : > { %4251 = vmatprep.subr.mxu0 %v6124_v38  ;;  %4294 = vmatprep.subr.mxu1 %v6124_v38 }
 0x32e   : > { %4252 = vmatpush3.msra.mxu0 %v4884_v21  ;;  %4295 = vmatpush3.msra.mxu1 %v4902_v28 }
 0x32f   : > { %4253 = vmatprep.subr.mxu0 %v6124_v38  ;;  %4296 = vmatprep.subr.mxu1 %v6124_v38 }
 0x330   : > { %4254 = vmatpush3.msra.mxu0 %v4908_v30  ;;  %4297 = vmatpush3.msra.mxu1 %v4921_v35 }
 0x331   : > { %4255 = vmatprep.subr.mxu0 %v6124_v38  ;;  %4298 = vmatprep.subr.mxu1 %v6124_v38 }
 0x332   : > { %4256 = vmatpush3.msra.mxu0 %v4918_v34  ;;  %4299 = vmatpush3.msra.mxu1 %v4943_v45 }
 0x333   : > { %4257 = vmatprep.subr.mxu0 %v6124_v38  ;;  %4300 = vmatprep.subr.mxu1 %v6124_v38 }
 0x334   : > { %4258 = vmatpush3.msra.mxu0 %v4937_v43  ;;  %4301 = vmatpush3.msra.mxu1 %v4953_v48 }
 0x335   : > { %4259 = vmatprep.subr.mxu0 %v6124_v38  ;;  %4302 = vmatprep.subr.mxu1 %v6124_v38 }
 0x336   : > { %4260 = vmatpush3.msra.mxu0 %v4949_v47  ;;  %4303 = vmatpush3.msra.mxu1 %v4982_v59 }
 0x337   : > { %4261 = vmatprep.subr.mxu0 %v6124_v38  ;;  %4304 = vmatprep.subr.mxu1 %v6124_v38 }
 0x338   : > { %4262 = vmatpush3.msra.mxu0 %v4969_v55  ;;  %4305 = vmatpush3.msra.mxu1 %v4992_v63 }
 0x339   : > { %4263 = vmatprep.subr.mxu0 %v6124_v38  ;;  %4306 = vmatprep.subr.mxu1 %v6124_v38 }
 0x33a   : > { %4264 = vmatpush3.msra.mxu0 %v4985_v61  ;;  %4307 = vmatpush3.msra.mxu1 %v5010_v13 }
 0x33b   : > { %4265 = vmatprep.subr.mxu0 %v6124_v38  ;;  %4308 = vmatprep.subr.mxu1 %v6124_v38 }
 0x33c   : > { %4266 = vmatpush3.msra.mxu0 %v5004_v8  ;;  %4309 = vmatpush3.msra.mxu1 %v5028_v32 }
 0x33d   : > { %4267 = vmatprep.subr.mxu0 %v6124_v38  ;;  %4311 = vmatmul.mubr.f32.vlgmr.msra.gmra.mxu1 %v2376_v39 }
 0x33e   : > { %4348 = vmatprep.subr.mxu1 %v6124_v38  ;;  %4268 = vmatpush3.msra.mxu0 %v5024_v31 }
 0x33f   : > { %4349 = vmatpush3.msra.mxu1 %v4855_v4  ;;  %4269 = vmatprep.subr.mxu0 %v6124_v38  ;;  %v6157_v4 = vld [vmem:[#allocation27_spill] sm:$0xff] }
 0x340   : > { %4350 = vmatprep.subr.mxu1 %v6124_v38  ;;  %4270 = vmatpush3.msra.mxu0 %v5040_v41 }
 0x341   : > { %4351 = vmatpush3.msra.mxu1 %v4857_v5  ;;  %4271 = vmatprep.subr.mxu0 %v6124_v38  ;;  %v6158_v5 = vld [vmem:[#allocation29_spill] sm:$0xff] }
 0x342   : > { %4352 = vmatprep.subr.mxu1 %v6124_v38  ;;  %4272 = vmatpush3.msra.mxu0 %v5055_v54 }
 0x343   : > { %4353 = vmatpush3.msra.mxu1 %v4859_v6  ;;  %4273 = vmatprep.subr.mxu0 %v6124_v38  ;;  %v6159_v6 = vld [vmem:[#allocation31_spill] sm:$0xff] }
 0x344   : > { %4354 = vmatprep.subr.mxu1 %v6124_v38  ;;  %4274 = vmatpush3.msra.mxu0 %v5069_v50 }
 0x345   : > { %4275 = vmatprep.mubr.msk.f32.mxu0 %vm4650_vm0, %v6124_v38  ;;  %4355 = vmatpush3.msra.mxu1 %v4861_v10  ;;  %v6160_v10 = vld [vmem:[#allocation33_spill] sm:$0xff] }
 0x346   : > { %4276 = vmatmul.mubr.f32.vlgmr.msra.gmra.mxu0 %v5808_v49  ;;  %4313 = vmatprep.subr.mxu0 %v6124_v38 }
 0x347   : > { %4356 = vmatprep.subr.mxu1 %v6124_v38  ;;  %4314 = vmatpush3.msra.mxu0 %v4888_v22 }
 0x348   : > { %4357 = vmatpush3.msra.mxu1 %v4863_v11  ;;  %4315 = vmatprep.subr.mxu0 %v6124_v38  ;;  %v6161_v11 = vld [vmem:[#allocation35_spill] sm:$0xff] }
 0x349   : > { %4358 = vmatprep.subr.mxu1 %v6124_v38  ;;  %4316 = vmatpush3.msra.mxu0 %v4891_v23 }
 0x34a   : > { %4359 = vmatpush3.msra.mxu1 %v4865_v12  ;;  %4317 = vmatprep.subr.mxu0 %v6124_v38 }
 0x34b   : > { %4360 = vmatprep.subr.mxu1 %v6124_v38  ;;  %4318 = vmatpush3.msra.mxu0 %v4894_v24 }
 0x34c   : > { %4361 = vmatpush3.msra.mxu1 %v4874_v17  ;;  %4319 = vmatprep.subr.mxu0 %v6124_v38 }
 0x34d   : > { %4362 = vmatprep.subr.mxu1 %v6124_v38  ;;  %4320 = vmatpush3.msra.mxu0 %v4900_v27 }
 0x34e   : > { %4363 = vmatpush3.msra.mxu1 %v4896_v25  ;;  %4321 = vmatprep.subr.mxu0 %v6124_v38 }
 0x34f   : > { %4364 = vmatprep.subr.mxu1 %v6124_v38  ;;  %4322 = vmatpush3.msra.mxu0 %v4905_v29 }
 0x350   : > { %4365 = vmatpush3.msra.mxu1 %v4902_v28  ;;  %4323 = vmatprep.subr.mxu0 %v6124_v38 }
 0x351   : > { %4366 = vmatprep.subr.mxu1 %v6124_v38  ;;  %4324 = vmatpush3.msra.mxu0 %v4931_v40 }
 0x352   : > { %4367 = vmatpush3.msra.mxu1 %v4921_v35  ;;  %4325 = vmatprep.subr.mxu0 %v6124_v38 }
 0x353   : > { %4368 = vmatprep.subr.mxu1 %v6124_v38  ;;  %4326 = vmatpush3.msra.mxu0 %v4946_v46 }
 0x354   : > { %4369 = vmatpush3.msra.mxu1 %v4943_v45  ;;  %4327 = vmatprep.subr.mxu0 %v6124_v38 }
 0x355   : > { %4370 = vmatprep.subr.mxu1 %v6124_v38  ;;  %4328 = vmatpush3.msra.mxu0 %v4966_v53 }
 0x356   : > { %4371 = vmatpush3.msra.mxu1 %v4953_v48  ;;  %4329 = vmatprep.subr.mxu0 %v6124_v38 }
 0x357   : > { %4372 = vmatprep.subr.mxu1 %v6124_v38  ;;  %4330 = vmatpush3.msra.mxu0 %v4976_v57 }
 0x358   : > { %4373 = vmatpush3.msra.mxu1 %v4982_v59  ;;  %4331 = vmatprep.subr.mxu0 %v6124_v38 }
 0x359   : > { %4374 = vmatprep.subr.mxu1 %v6124_v38  ;;  %4332 = vmatpush3.msra.mxu0 %v5001_v3 }
 0x35a   : > { %4375 = vmatpush3.msra.mxu1 %v4992_v63  ;;  %4333 = vmatprep.subr.mxu0 %v6124_v38 }
 0x35b   : > { %4376 = vmatprep.subr.mxu1 %v6124_v38  ;;  %4334 = vmatpush3.msra.mxu0 %v5017_v19 }
 0x35c   : > { %4377 = vmatpush3.msra.mxu1 %v5010_v13  ;;  %4335 = vmatprep.subr.mxu0 %v6124_v38 }
 0x35d   : > { %4378 = vmatprep.subr.mxu1 %v6124_v38  ;;  %4336 = vmatpush3.msra.mxu0 %v6157_v4 }
 0x35e   : > { %4379 = vmatpush3.msra.mxu1 %v5028_v32  ;;  %4380 = vmatprep.mubr.msk.f32.mxu1 %vm4650_vm0, %v6124_v38 }
 0x35f   : > { %4337 = vmatprep.subr.mxu0 %v6124_v38  ;;  %4381 = vmatmul.mubr.f32.vlgmr.msra.gmra.mxu1 %v5805_v33 }
 0x360   : > { %4338 = vmatpush3.msra.mxu0 %v6158_v5  ;;  %4345 = vmatprep.mubr.msk.f32.mxu0 %vm4650_vm0, %v6124_v38 }
 0x361   : > { %4339 = vmatprep.subr.mxu0 %v6124_v38 }
 0x362   : > { %4340 = vmatpush3.msra.mxu0 %v6159_v6 }
 0x363   : > { %4341 = vmatprep.subr.mxu0 %v6124_v38 }
 0x364   : > { %4342 = vmatpush3.msra.mxu0 %v6160_v10 }
 0x365   : > { %4343 = vmatprep.subr.mxu0 %v6124_v38 }
 0x366   : > { %4344 = vmatpush3.msra.mxu0 %v6161_v11 }
 0x367   : > { %4346 = vmatmul.mubr.f32.vlgmr.msra.gmra.mxu0 %v5805_v33 }
 0x368   : > { %4553 = shalt.err (!%p4550_p9)
}
 0x369   : > { %s4554_s15 = scalar_lea.hbm %s2966_s7, 128  ;;  %s4558_s30 = scalar_lea.hbm %s6016_s5, 512 }
 0x36a   : > { %p4555_p1 = scmp.ne.s32.totalorder %s2966_s7, %s4554_s15  ;;  %p4559_p7 = scmp.lt.s32.totalorder %s2966_s7, %s6016_s5 }
 0x36b   : > { %p4560_p10 = scmp.lt.s32.totalorder %s4558_s30, %s4554_s15 }
 0x36c   : > { %p4556_p4 = pnand %p4555_p1, %p6162_p11 }
 0x36d   : > { %p4561_p8 = por %p4560_p10, %p4559_p7 }
 0x36e   : > { %p4557_p6 = pneg %p4556_p4 }
 0x370   : > { %p4562_p3 = pnand %p4561_p8, %p4557_p6 }
 0x372   : > { %4565 = shalt.err (!%p4562_p3)
}
 0x373   : > { %4391 = dma.vmem_to_hbm [thread:$0]  (%p6162_p11), %s2969_s11, 128, %s2966_s7, %s2950_s16   ;;  %v6163_v45 = vld [vmem:[#allocation19_spill] sm:$0xff]  ;;  %v6164_v47 = vld [vmem:[#allocation20_spill] sm:$0xff]  ;;  %v6165_v55 = vld [vmem:[#allocation22_spill] sm:$0xff] }
 0x374   : > { %v2939_v46 = vsub.s32 1, %v6163_v45  ;;  %s328_s14 = scalar_lea.vmem [#allocation9], %s4831_s23  ;;  %s2979_s16 = scalar_lea.hbm %s6017_s6, %s3131_s13 }
 0x375   : > { %s2981_s26 = sshll.u32 %s328_s14, 4  ;;  %s2955_s8 = scalar_lea.sflag [#allocation10], %s4828_s4  ;;  %s2982_s26 = int_to_ptr.vmem [resolvable:$true] %s2981_s26 }
 0x376   : > { %v2940_v48 = vrot.slane %v6164_v47, %v2939_v46  ;;  %v2946_v57 = vrot.slane %v6165_v55, %v2939_v46  ;;  %s4566_s10 = scalar_lea.vmem %s2982_s26, 128  ;;  %s4652_s29 = smov [#allocation9]  }
 0x377   : > { %p4567_p12 = scmp.ne.s32.totalorder %s2982_s26, %s4566_s10  ;;  %s4570_s12 = sshll.u32 %s4652_s29, 4  ;;  %s4571_s12 = int_to_ptr.vmem [resolvable:$false] %s4570_s12 }
 0x378   : > { %s4572_s23 = scalar_lea.vmem %s4571_s12, 256  ;;  %p4573_p0 = scmp.lt.s32.totalorder %s2982_s26, %s4571_s12 }
 0x379   : > { %p4568_p2 = pnand %p4567_p12, %p6162_p11  ;;  %p4574_p5 = scmp.lt.s32.totalorder %s4572_s23, %s4566_s10 }
 0x37b   : > { %p4569_p13 = pneg %p4568_p2  ;;  %p4575_p9 = por %p4574_p5, %p4573_p0 }
 0x37d   : > { %p4576_p1 = pnand %p4575_p9, %p4569_p13 }
 0x3dd   : > { %v2531_v12 = vpop.f32.mrf.mxu1 }
 0x3df   : > { %v4242_v15 = vpop.f32.mrf.mxu1 }
 0x3e5   : > { %v2380_v16 = vpop.f32.mrf.mxu0 }
 0x3e6   : > { %v2532_v24 = vadd.f32 %v2531_v12, %v2380_v16 }
 0x3e7   : > { %v4207_v17 = vpop.f32.mrf.mxu0 }
 0x3fd   : > { %v2724_v18 = vpop.f32.mrf.mxu1 }
 0x3ff   : > { %v4312_v20 = vpop.f32.mrf.mxu1 }
 0x406   : > { %v2635_v21 = vpop.f32.mrf.mxu0 }
 0x407   : > { %v2636_v27 = vadd.f32 %v2635_v21, %v2532_v24 }
 0x408   : > { %v4277_v22 = vpop.f32.mrf.mxu0 }
 0x409   : > { %v2725_v28 = vadd.f32 %v2724_v18, %v2636_v27 }
 0x41f   : > { %v2930_v23 = vpop.f32.mrf.mxu1 }
 0x421   : > { %v4382_v25 = vpop.f32.mrf.mxu1 }
 0x427   : > { %v2843_v29 = vpop.f32.mrf.mxu0 }
 0x428   : > { %v2844_v30 = vadd.f32 %v2843_v29, %v2725_v28 }
 0x429   : > { %v4347_v34 = vpop.f32.mrf.mxu0 }
 0x42a   : > { %v2931_v35 = vadd.f32 %v2930_v23, %v2844_v30 }
 0x42c   : > { %v2934_v40 = vmul.f32 0.03125, %v2931_v35 }
 0x42e   : > { %v2935_v43 = vadd.f32 1e-06, %v2934_v40 }
 0x430   : > { %4456 = vrsqrt.f32 %v2935_v43 }
 0x43d   : > { %v4457_v50 = vpop.eup %4456 }
 0x43e   : > { %v2941_v53 = vmul.f32 %v4457_v50, %v2940_v48 }
 0x440   : > { %v2942_v59 = vmul.f32 %v2941_v53, %v5801_v2 }
 0x442   : > { %v2947_v61 = vadd.f32 %v2946_v57, %v2942_v59 }
 0x444   : > { %2948 = vst [vmem:[%s328_s14] sm:$0xff] %v2947_v61 }
 0x445   : > { %4579 = shalt.err (!%p4576_p1)
}
 0x446   : > { %s4580_s25 = scalar_lea.hbm %s2979_s16, 128  ;;  %s4584_s15 = scalar_lea.hbm %s6017_s6, 512 }
 0x447   : > { %p4581_p4 = scmp.ne.s32.totalorder %s2979_s16, %s4580_s25  ;;  %p4585_p10 = scmp.lt.s32.totalorder %s2979_s16, %s6017_s6 }
 0x448   : > { %p4586_p8 = scmp.lt.s32.totalorder %s4584_s15, %s4580_s25 }
 0x449   : > { %p4582_p6 = pnand %p4581_p4, %p6162_p11 }
 0x44a   : > { %p4587_p3 = por %p4586_p8, %p4585_p10 }
 0x44b   : > { %p4583_p7 = pneg %p4582_p6 }
 0x44d   : > { %p4588_p12 = pnand %p4587_p3, %p4583_p7 }
 0x44f   : > { %4591 = shalt.err (!%p4588_p12)
}
 0x450   : > { %4392 = dma.vmem_to_hbm [thread:$0]  (%p6162_p11), %s2982_s26, 128, %s2979_s16, %s2955_s8  }
 0x451 PF: > { %p4416_p2 = scmp.ge.s32.totalorder %s4642_s24, 2  ;;  %s2993_s30 = sand.u32 1, %s4630_s21  }
 0x452   : > { %p6166_p13 = scmp.ne.s32.totalorder %s6079_s28, 0  ;;  %s2994_s19 = scalar_lea.sflag [#allocation4], %s2993_s30 }
 0x454   : > { %p4407_p0 = pnand %p4416_p2, %p6166_p13 }
 0x456   : > { %p4408_p5 = pneg %p4407_p0 }
 0x458   : > { %4621 = dma.done.wait (%p4408_p5), %s2994_s19, 128  }
 0x459   : > { %4623 = vsyncadd (%p4408_p5), %s2994_s19, 4294967168  ;;  %s3003_s20 = scalar_lea.sflag [#allocation10], %s2993_s30 }
 0x45a   : > { %4625 = dma.done.wait (%p4408_p5), %s3003_s20, 128  }
 0x45b   : > { %4627 = vsyncadd (%p4408_p5), %s3003_s20, 4294967168  ;;  %s6167_s14 = sld [smem:[#allocation16_spill]]  ;;  %p26_p11 = scmp.ge.s32.totalorder %s4741_s9, 6  }
 0x45c   : > { %s6168_s23 = sld [smem:[#allocation17_spill]]  ;;  %s6169_s21 = smov %s4634_s22 }
 0x45d   : > { %s6171_s24 = smov %s4741_s9  ;;  %28 = sbr.rel (!%p26_p11) target bundleno = 11 (0xb), region = 119 }
 0x461   : > { %s6170_s22 = smov %s6167_s14 }
 0x462   :  { %3008 = vsyncpa [#allocation3], 1 }
 0x463   :  { %3010 = vsyncpa [#allocation3 + $0x1], 1 }
 0x464   :  { %3011 = vsyncpa [#allocation6], 1 }
 0x465   :  { %3013 = vsyncpa [#allocation6 + $0x1], 1 }
 0x466   :  { %3014 = vsyncpa [#allocation4], 1 }
 0x467   :  { %3016 = vsyncpa [#allocation4 + $0x1], 1 }
 0x468   :  { %3017 = vsyncpa [#allocation10], 1 }
 0x469   :  { %3019 = vsyncpa [#allocation10 + $0x1], 1 }

</bundles_post_ra>
